<compile_context>
chip_gen: v7x
topology: tpu7x:2x2x1
jax: 0.10.0
libtpu: 0.0.40
codegen_flags: <defaults>
</compile_context>

<pallas_src>
import functools

import jax
import jax.numpy as jnp
from jax.experimental import pallas as pl
from jax.experimental.pallas import tpu as pltpu


# ----------------------------- FC (Linear) kernel -----------------------------

def _fc_kernel(z_ref, w_ref, b_ref, o_ref):
    # z: (B, F) bf16, w: (F, TM) bf16, b: (1, TM) f32 -> o: (B, TM) f32
    o_ref[...] = (jnp.dot(z_ref[...], w_ref[...],
                          preferred_element_type=jnp.float32)
                  + b_ref[...]).astype(o_ref.dtype)


def fc_forward(z, w_t_bf16, b, tile_m=16384):
    B, F = z.shape
    M = w_t_bf16.shape[1]
    tile_m = min(tile_m, M)
    while M % tile_m != 0:
        tile_m //= 2
    zb = z.astype(jnp.bfloat16)   # bf16 MXU matmul with f32 accumulation
    return pl.pallas_call(
        _fc_kernel,
        out_shape=jax.ShapeDtypeStruct((B, M), jnp.float32),
        grid=(M // tile_m,),
        in_specs=[
            pl.BlockSpec((B, F), lambda j: (0, 0)),
            pl.BlockSpec((F, tile_m), lambda j: (0, j)),
            pl.BlockSpec((1, tile_m), lambda j: (0, j)),
        ],
        out_specs=pl.BlockSpec((B, tile_m), lambda j: (0, j)),
        compiler_params=pltpu.CompilerParams(
            dimension_semantics=("parallel",)),
    )(zb, w_t_bf16, b.reshape(1, M))


# --------------------- BatchNorm statistics (training mode) -------------------
# Stats of the (virtual) unpooled tensor, computed from the 4x smaller
# pre-unpool tensor: zero-inserted positions contribute nothing to the sums.

def _bn_stats_kernel(x_ref, sum_ref, ssq_ref):
    @pl.when(pl.program_id(0) == 0)
    def _():
        sum_ref[...] = jnp.zeros_like(sum_ref)
        ssq_ref[...] = jnp.zeros_like(ssq_ref)

    _, H, W, C = x_ref.shape
    x = x_ref[...].astype(jnp.float32).reshape(H * W, C)
    sum_ref[...] += jnp.sum(x, axis=0, keepdims=True)
    ssq_ref[...] += jnp.sum(x * x, axis=0, keepdims=True)


def _bn_batch_stats_pre_unpool(x):
    B, H, W, C = x.shape
    s, ss = pl.pallas_call(
        _bn_stats_kernel,
        out_shape=(jax.ShapeDtypeStruct((1, C), jnp.float32),
                   jax.ShapeDtypeStruct((1, C), jnp.float32)),
        grid=(B,),
        in_specs=[pl.BlockSpec((1, H, W, C), lambda bi: (bi, 0, 0, 0))],
        out_specs=(pl.BlockSpec((1, C), lambda bi: (0, 0)),
                   pl.BlockSpec((1, C), lambda bi: (0, 0))),
        compiler_params=pltpu.CompilerParams(
            dimension_semantics=("arbitrary",)),
    )(x)
    n = 4.0 * B * H * W                      # count over the UNPOOLED tensor
    mean = s[0] / n
    var = jnp.maximum(ss[0] / n - mean * mean, 0.0)
    return mean, var


# ------------- fused MaxUnpool2x2 + BatchNorm + ConvTranspose(3x3,s1,p1) -------
# ConvTranspose2d(k3,s1,p1) == 3x3 "same" cross-correlation with the spatially
# flipped, (Cin,Cout)-swapped kernel.  On the unpooled input, each of the 4
# output phases (pr,pc) only sees 1/2/2/4 of the 9 taps hitting real data, so
# the whole stage reduces to 9 matmuls on the PRE-unpool tensor.

def _convtranspose_to_conv(w_t):
    # PyTorch ConvTranspose2d weight (Cin, Cout, kH, kW) -> HWIO conv kernel:
    # W[ky,kx,ci,co] = Wt[ci,co,2-ky,2-kx]
    return jnp.flip(w_t, axis=(2, 3)).transpose(2, 3, 0, 1)


def _fused_deconv_kernel(x_ref, xh_ref, w_ref, sw_ref, o_ref, *, apply_sigmoid):
    # x_ref : (1, tH, W, Cin)   pre-unpool rows [t*tH, (t+1)*tH)
    # xh_ref: (1, 1, W, Cin)    halo = first pre-unpool row of the next tile
    # w_ref : (3, 3, Cin, Cout) conv weights with BN scale folded in
    # sw_ref: (9, Cout)         per-tap (BN-shift . W) table, center += conv bias
    # o_ref : (1, 2*tH, 2*W, Cout)
    t = pl.program_id(1)
    n_t = pl.num_programs(1)
    _, tH, W, Cin = x_ref.shape
    Cout = o_ref.shape[-1]
    H_total = n_t * tH

    x = x_ref[0]                                    # (tH, W, Cin)
    halo = xh_ref[0, 0]                             # (W, Cin)
    # On the last row tile the halo row lies below the image -> contributes 0
    # (it falls on the conv zero-padding ring of the unpooled tensor).
    halo = halo * (t != n_t - 1).astype(halo.dtype)

    zcol = jnp.zeros((tH, 1, Cin), x.dtype)
    x_d = jnp.concatenate([x[1:], halo[None]], axis=0)      # x[i+1, j]
    x_r = jnp.concatenate([x[:, 1:], zcol], axis=1)         # x[i, j+1]
    x_dr = jnp.concatenate([x_d[:, 1:], zcol], axis=1)      # x[i+1, j+1]

    M = tH * W

    def tap(a, ky, kx):
        return jnp.dot(a.reshape(M, Cin), w_ref[ky, kx],
                       preferred_element_type=jnp.float32)

    # x-contributions of the 4 output phases (pr, pc).
    p00 = tap(x, 1, 1)
    p01 = tap(x, 1, 0) + tap(x_r, 1, 2)
    p10 = tap(x, 0, 1) + tap(x_d, 2, 1)
    p11 = tap(x, 0, 0) + tap(x_r, 0, 2) + tap(x_d, 2, 0) + tap(x_dr, 2, 2)

    # BN-shift (+ conv bias) contribution: sum of the per-tap table over the
    # taps that fall INSIDE the unpooled image (border taps hit the zero pad).
    sw = sw_ref[...]                                 # (9, Cout)
    sw_vecs = [sw[k:k + 1, :].reshape(1, 1, Cout) for k in range(9)]
    gi = jax.lax.broadcasted_iota(jnp.int32, (tH, 1, 1), 0) + t * tH
    gj = jax.lax.broadcasted_iota(jnp.int32, (1, W, 1), 1)
    ones_r = jnp.ones((tH, 1, 1), jnp.float32)
    ones_c = jnp.ones((1, W, 1), jnp.float32)

    def shift_term(pr, pc):
        if pr == 1:
            m_top, m_bot = ones_r, (gi < H_total - 1).astype(jnp.float32)
        else:
            m_top, m_bot = (gi >= 1).astype(jnp.float32), ones_r
        if pc == 1:
            m_left, m_right = ones_c, (gj < W - 1).astype(jnp.float32)
        else:
            m_left, m_right = (gj >= 1).astype(jnp.float32), ones_c
        rm = (m_top, ones_r, m_bot)
        cm = (m_left, ones_c, m_right)
        total = None
        for ky in range(3):
            inner = (cm[0] * sw_vecs[ky * 3 + 0]
                     + cm[1] * sw_vecs[ky * 3 + 1]
                     + cm[2] * sw_vecs[ky * 3 + 2])          # (1, W, Cout)
            term = rm[ky] * inner                             # (tH, W, Cout)
            total = term if total is None else total + term
        return total

    p00 = p00.reshape(tH, W, Cout) + shift_term(0, 0)
    p01 = p01.reshape(tH, W, Cout) + shift_term(0, 1)
    p10 = p10.reshape(tH, W, Cout) + shift_term(1, 0)
    p11 = p11.reshape(tH, W, Cout) + shift_term(1, 1)

    if apply_sigmoid:
        p00 = jax.nn.sigmoid(p00)
        p01 = jax.nn.sigmoid(p01)
        p10 = jax.nn.sigmoid(p10)
        p11 = jax.nn.sigmoid(p11)

    # Re-interleave the 4 phases into the dense (2*tH, 2*W, Cout) output tile
    # inside VMEM (column interleave via lane-concat + reshape, row interleave
    # via a leading-dim merge).
    top = jnp.concatenate([p00, p01], axis=-1).reshape(tH, 2 * W, Cout)
    bot = jnp.concatenate([p10, p11], axis=-1).reshape(tH, 2 * W, Cout)
    out = jnp.concatenate([top[:, None], bot[:, None]],
                          axis=1).reshape(2 * tH, 2 * W, Cout)
    o_ref[0] = out.astype(o_ref.dtype)


def _pick_tile_rows(H, W, Cin, target_bytes=1 << 20, max_rows=32):
    per_row = W * Cin * 4
    tr = int(max(1, min(H, max_rows, target_bytes // per_row)))
    while H % tr:
        tr -= 1
    return tr


def fused_unpool_bn_deconv(x, gamma, beta, w_t, b, *, eps=1e-5,
                           apply_sigmoid=False, tile_rows=None):
    """MaxUnpool2x2 (zero insertion) -> BatchNorm2d (batch stats) ->
    ConvTranspose2d(k3,s1,p1) [-> Sigmoid], as one fused Pallas kernel."""
    B, H, W, Cin = x.shape
    Cout = w_t.shape[1]

    mean, var = _bn_batch_stats_pre_unpool(x)
    scale = gamma * jax.lax.rsqrt(var + eps)
    shift = beta - mean * scale

    wk = _convtranspose_to_conv(w_t)                      # (3,3,Cin,Cout)
    wk_s = wk * scale[None, None, :, None]                # fold BN scale
    sw = jnp.einsum("c,yxcd->yxd", shift, wk).reshape(9, Cout)
    sw = sw.at[4].add(b)                                  # center tap is always valid

    if tile_rows is None:
        tile_rows = _pick_tile_rows(H, W, Cin)
    assert H % tile_rows == 0
    n_t = H // tile_rows

    kern = functools.partial(_fused_deconv_kernel, apply_sigmoid=apply_sigmoid)
    return pl.pallas_call(
        kern,
        out_shape=jax.ShapeDtypeStruct((B, 2 * H, 2 * W, Cout), jnp.float32),
        grid=(B, n_t),
        in_specs=[
            pl.BlockSpec((1, tile_rows, W, Cin), lambda bi, ti: (bi, ti, 0, 0)),
            pl.BlockSpec((1, 1, W, Cin),
                         lambda bi, ti: (bi, jnp.minimum((ti + 1) * tile_rows,
                                                         H - 1), 0, 0)),
            pl.BlockSpec((3, 3, Cin, Cout), lambda bi, ti: (0, 0, 0, 0)),
            pl.BlockSpec((9, Cout), lambda bi, ti: (0, 0)),
        ],
        out_specs=pl.BlockSpec((1, 2 * tile_rows, 2 * W, Cout),
                               lambda bi, ti: (bi, ti, 0, 0)),
        compiler_params=pltpu.CompilerParams(
            dimension_semantics=("parallel", "parallel")),
    )(x, x, wk_s, sw)


# -------------------------------- Decoder -------------------------------------

def init_decoder_params(key, features, img_channels=3, img_dim=32):
    # The module hardcodes a (img_dim // 4)^2 fc grid; kept at small img_dim.
    base = img_dim // 4
    M = 256 * base * base
    ks = jax.random.split(key, 6)
    fc_w_t = jax.random.normal(ks[0], (features, M), jnp.float32) * 0.02
    fc_b = jax.random.normal(ks[1], (M,), jnp.float32) * 0.02
    # Pre-permute the fc columns (PyTorch NCHW flat order -> NHWC flat order)
    # so the FC kernel's output is directly NHWC: no big transpose afterwards.
    m = jnp.arange(M)
    c = m % 256
    w_ = (m // 256) % base
    h = m // (256 * base)
    perm = c * (base * base) + h * base + w_
    return {
        "base": base,
        "fc_w_t": fc_w_t[:, perm].astype(jnp.bfloat16),  # bf16: halves HBM read
        "fc_b": fc_b[perm],
        # ConvTranspose2d weights in PyTorch layout (Cin, Cout, kH, kW)
        "dc2_w": jax.random.normal(ks[2], (256, 64, 3, 3), jnp.float32) * 0.02,
        "dc2_b": jax.random.normal(ks[3], (64,), jnp.float32) * 0.02,
        "dc1_w": jax.random.normal(ks[4], (64, img_channels, 3, 3),
                                   jnp.float32) * 0.02,
        "dc1_b": jax.random.normal(ks[5], (img_channels,), jnp.float32) * 0.02,
        # BatchNorm2d defaults: weight=1, bias=0
        "bn2_g": jnp.ones((256,), jnp.float32),
        "bn2_b": jnp.zeros((256,), jnp.float32),
        "bn1_g": jnp.ones((64,), jnp.float32),
        "bn1_b": jnp.zeros((64,), jnp.float32),
    }


def decoder_forward(params, z, *, tile_rows=None):
    assert z.ndim == 2
    base = params["base"]
    B = z.shape[0]

    # fc (+ Unflatten): output is already NHWC thanks to the permuted weights.
    y = fc_forward(z, params["fc_w_t"], params["fc_b"])   # (B, base*base*256)
    x = y.reshape(B, base, base, 256)

    # deconv_2: unpool -> BN(256) -> ConvTranspose(256 -> 64)  (fused)
    x = fused_unpool_bn_deconv(x, params["bn2_g"], params["bn2_b"],
                               params["dc2_w"], params["dc2_b"],
                               apply_sigmoid=False, tile_rows=tile_rows)

    # deconv_1: unpool -> BN(64) -> ConvTranspose(64 -> C) -> Sigmoid  (fused)
    x = fused_unpool_bn_deconv(x, params["bn1_g"], params["bn1_b"],
                               params["dc1_w"], params["dc1_b"],
                               apply_sigmoid=True, tile_rows=tile_rows)

    # TODO(synk): the final NHWC->NCHW transpose stays in XLA; emitting NCHW
    # directly (W on lanes) would need per-channel plane stores from the kernel.
    return x.transpose(0, 3, 1, 2)


# ----------------------------- pure-JAX reference -----------------------------

def _reference_forward(params, z):
    # TODO(synk): nn.MaxUnpool2d is called without pooling indices in the
    # reference forward (would raise in PyTorch); interpreted here (and in the
    # kernels) as zero-insertion unpooling.
    base = params["base"]
    B = z.shape[0]
    y = jnp.dot(z.astype(jnp.bfloat16), params["fc_w_t"],
                preferred_element_type=jnp.float32) + params["fc_b"]
    x = y.reshape(B, base, base, 256)

    def stage(x, gamma, beta, w_t, bias, sigmoid):
        Bq, H, W, Cin = x.shape
        u = jnp.zeros((Bq, 2 * H, 2 * W, Cin), x.dtype).at[:, ::2, ::2, :].set(x)
        mean = jnp.mean(u, axis=(0, 1, 2))
        var = jnp.var(u, axis=(0, 1, 2))
        v = (u - mean) * jax.lax.rsqrt(var + 1e-5) * gamma + beta
        wk = _convtranspose_to_conv(w_t)
        out = jax.lax.conv_general_dilated(
            v, wk, window_strides=(1, 1), padding="SAME",
            dimension_numbers=("NHWC", "HWIO", "NHWC")) + bias
        return jax.nn.sigmoid(out) if sigmoid else out

    x = stage(x, params["bn2_g"], params["bn2_b"],
              params["dc2_w"], params["dc2_b"], False)
    x = stage(x, params["bn1_g"], params["bn1_b"],
              params["dc1_w"], params["dc1_b"], True)
    return x.transpose(0, 3, 1, 2)


if __name__ == "__main__":
    features = 32
    batch = 2
    img_channels = 3
    img_dim = 32   # small-shape run; module default 256 gives the 64x64 fc grid

    key = jax.random.PRNGKey(0)
    pkey, zkey = jax.random.split(key)
    params = init_decoder_params(pkey, features, img_channels, img_dim)
    z = jax.random.normal(zkey, (batch, features), jnp.float32)

    x_rec = decoder_forward(params, z)
    jax.block_until_ready(x_rec)
    assert x_rec.shape == (batch, img_channels, img_dim, img_dim)
    assert bool(jnp.all(jnp.isfinite(x_rec)))

    ref = _reference_forward(params, z)
    err = float(jnp.max(jnp.abs(x_rec - ref)))
    assert err < 5e-3, f"mismatch vs reference: {err}"

    # Exercise the multi-row-tile path (halo row + last-tile masking) as well.
    x_rec_tiled = decoder_forward(params, z, tile_rows=4)
    jax.block_until_ready(x_rec_tiled)
    err_tiled = float(jnp.max(jnp.abs(x_rec_tiled - ref)))
    assert err_tiled < 5e-3, f"tiled-path mismatch vs reference: {err_tiled}"

    print("KERNEL_OK")
</pallas_src>

<mosaic_0001>
module attributes {stable_mosaic.version = 11 : i64} {
  func.func @_fc_kernel(%arg0: i32, %arg1: memref<2x32xbf16, #tpu.memory_space<vmem>>, %arg2: memref<32x16384xbf16, #tpu.memory_space<vmem>>, %arg3: memref<1x16384xf32, #tpu.memory_space<vmem>>, %arg4: memref<2x16384xf32, #tpu.memory_space<vmem>>) attributes {dimension_semantics = [#tpu.dimension_semantics<parallel>], iteration_bounds = array<i64: 1>, scalar_prefetch = 0 : i64, scratch_operands = 0 : i64, tpu.core_type = #tpu.core_type<tc>, window_params = [{pipeline_mode = #tpu.pipeline_mode<synchronous>, transform_indices = @transform_0, window_bounds = array<i64: 2, 32>}, {transform_indices = @transform_1, window_bounds = array<i64: 32, 16384>}, {transform_indices = @transform_2, window_bounds = array<i64: 1, 16384>}, {transform_indices = @transform_3, window_bounds = array<i64: 2, 16384>}]} {
    %c0 = arith.constant 0 : index
    %c0_0 = arith.constant 0 : index
    %0 = vector.load %arg1[%c0, %c0_0] : memref<2x32xbf16, #tpu.memory_space<vmem>>, vector<2x32xbf16>
    %c0_1 = arith.constant 0 : index
    %c0_2 = arith.constant 0 : index
    %1 = vector.load %arg2[%c0_1, %c0_2] : memref<32x16384xbf16, #tpu.memory_space<vmem>>, vector<32x16384xbf16>
    %cst = arith.constant dense<0.000000e+00> : vector<2x16384xf32>
    %2 = tpu.matmul %0, %1, %cst {dimension_numbers = #tpu.dot_dimension_numbers<[1], [0], [0], [1], [0, 0, 1, 1], [], []>} : vector<2x32xbf16>, vector<32x16384xbf16>, vector<2x16384xf32> -> vector<2x16384xf32>
    %c0_3 = arith.constant 0 : index
    %c0_4 = arith.constant 0 : index
    %3 = vector.load %arg3[%c0_3, %c0_4] : memref<1x16384xf32, #tpu.memory_space<vmem>>, vector<1x16384xf32>
    %4 = vector.broadcast %3 : vector<1x16384xf32> to vector<2x16384xf32>
    %5 = arith.addf %2, %4 : vector<2x16384xf32>
    %c0_5 = arith.constant 0 : index
    %c0_6 = arith.constant 0 : index
    %6 = vector.load %arg4[%c0_5, %c0_6] : memref<2x16384xf32, #tpu.memory_space<vmem>>, vector<2x16384xf32>
    tpu.vector_store %arg4[%c0_5, %c0_6], %5 {strides = array<i32>} : memref<2x16384xf32, #tpu.memory_space<vmem>>, vector<2x16384xf32>,
    return
  }
  func.func @transform_0(%arg0: i32) -> (i32, i32) {
    %c0_i32 = arith.constant 0 : i32
    %c0_i32_0 = arith.constant 0 : i32
    %c0_i32_1 = arith.constant 0 : i32
    return %c0_i32, %c0_i32_0 : i32, i32
  }
  func.func @transform_1(%arg0: i32) -> (i32, i32) {
    %c0_i32 = arith.constant 0 : i32
    %c0_i32_0 = arith.constant 0 : i32
    return %c0_i32, %arg0 : i32, i32
  }
  func.func @transform_2(%arg0: i32) -> (i32, i32) {
    %c0_i32 = arith.constant 0 : i32
    %c0_i32_0 = arith.constant 0 : i32
    return %c0_i32, %arg0 : i32, i32
  }
  func.func @transform_3(%arg0: i32) -> (i32, i32) {
    %c0_i32 = arith.constant 0 : i32
    %c0_i32_0 = arith.constant 0 : i32
    return %c0_i32, %arg0 : i32, i32
  }
}

</mosaic_0001>

<bundles_post_ra>
// kernel: tpu_custom_call.1
= control target key start
LH: loop header
LB: loop body
LE: loop exit
PB: predicated region body
PF: predicated region fallthrough
CT: control target
= control target key end

     0   :  { %8 = vsyncpa [#allocation3], 0  ;;  %s6608_s0 = inlined_call_operand.hbm [shape: bf16[2,32], index: 0, kind: input, shape index: {}]   ;;  %s6609_s1 = inlined_call_operand.hbm [shape: bf16[32,16384], index: 1, kind: input, shape index: {}]   ;;  %s6610_s2 = inlined_call_operand.hbm [shape: f32[1,16384], index: 2, kind: input, shape index: {}]   ;;  %s6611_s3 = inlined_call_operand.hbm [shape: f32[2,16384], index: 3, kind: output, shape index: {}]  }
   0x1   :  { %9 = vsyncpa [#allocation6], 0 }
   0x2   :  { %10 = vsyncpa [#allocation4], 0  ;;  %s6065_s12 = smov [#allocation5]   ;;  %s5971_s16 = scalar_lea.hbm %s6609_s1, 32768 }
   0x3   :  { %s26_s13 = sshll.u32 %s6065_s12, 4  ;;  %p5972_p0 = scmp.ne.s32.totalorder %s6609_s1, %s5971_s16  ;;  %s27_s13 = int_to_ptr.vmem [resolvable:$true] %s26_s13 }
   0x4   :  { %p5975_p1 = scmp.lt.u32.totalorder %s5971_s16, %s6609_s1 }
   0x6   :  { %p5977_p2 = pnand %p5975_p1, %p5972_p0 }
   0x8   :  { %5980 = shalt.err (!%p5977_p2)
}
   0x9   :  { %s5981_s21 = scalar_lea.vmem %s27_s13, 32768  ;;  %p5986_p4 = scmp.lt.s32.totalorder %s27_s13, %s27_s13 }
   0xa   :  { %p5982_p3 = scmp.ne.s32.totalorder %s27_s13, %s5981_s21  ;;  %p5987_p5 = scmp.lt.s32.totalorder %s5981_s21, %s5981_s21 }
   0xc   :  { %p5988_p6 = por %p5987_p5, %p5986_p4 }
   0xe   :  { %p5989_p7 = pnand %p5988_p6, %p5982_p3 }
  0x10   :  { %5992 = shalt.err (!%p5989_p7)
}
  0x11   :  { %s6066_s22 = smov 8192   ;;  %s6067_s23 = smov 512  }
  0x12   :  { %32 = dma.hbm_to_vmem [thread:$0]  %s6609_s1, 32768, %s27_s13, [#allocation6], %s6066_s22, %s6066_s22, %s6067_s23  }
  0x13   :  { %s6068_s26 = smov [#allocation2]   ;;  %s6069_s28 = smov [#allocation7]  }
  0x14   :  { %s17_s27 = sshll.u32 %s6068_s26, 4  ;;  %s39_s29 = sshll.u32 %s6069_s28, 4  ;;  %s18_s27 = int_to_ptr.vmem [resolvable:$true] %s17_s27  ;;  %s40_s29 = int_to_ptr.vmem [resolvable:$true] %s39_s29 }
  0x15   :  { %s5993_s5 = scalar_lea.hbm %s6608_s0, 16 }
  0x16   :  { %p5994_p8 = scmp.ne.s32.totalorder %s6608_s0, %s5993_s5  ;;  %p5997_p9 = scmp.lt.u32.totalorder %s5993_s5, %s6608_s0 }
  0x18   :  { %p5999_p10 = pnand %p5997_p9, %p5994_p8 }
  0x1a   :  { %6002 = shalt.err (!%p5999_p10)
}
  0x1b   :  { %s6003_s1 = scalar_lea.vmem %s18_s27, 16  ;;  %s6007_s10 = scalar_lea.vmem %s18_s27, 32 }
  0x1c   :  { %p6004_p11 = scmp.ne.s32.totalorder %s18_s27, %s6003_s1  ;;  %p6008_p12 = scmp.lt.s32.totalorder %s18_s27, %s18_s27 }
  0x1d   :  { %p6009_p13 = scmp.lt.s32.totalorder %s6007_s10, %s6003_s1 }
  0x1f   :  { %p6010_p0 = por %p6009_p13, %p6008_p12 }
  0x21   :  { %p6011_p1 = pnand %p6010_p0, %p6004_p11 }
  0x23   :  { %6014 = shalt.err (!%p6011_p1)
}
  0x24   :  { %20 = dma.hbm_to_vmem [thread:$0]  %s6608_s0, 16, %s18_s27, [#allocation3]  }
  0x25   :  { %s6015_s15 = scalar_lea.hbm %s6610_s2, 2048 }
  0x26   :  { %p6016_p2 = scmp.ne.s32.totalorder %s6610_s2, %s6015_s15  ;;  %p6019_p3 = scmp.lt.u32.totalorder %s6015_s15, %s6610_s2 }
  0x28   :  { %p6021_p4 = pnand %p6019_p3, %p6016_p2 }
  0x2a   :  { %6024 = shalt.err (!%p6021_p4)
}
  0x2b   :  { %s6025_s20 = scalar_lea.vmem %s40_s29, 2048  ;;  %p6030_p6 = scmp.lt.s32.totalorder %s40_s29, %s40_s29 }
  0x2c   :  { %p6026_p5 = scmp.ne.s32.totalorder %s40_s29, %s6025_s20  ;;  %p6031_p7 = scmp.lt.s32.totalorder %s6025_s20, %s6025_s20 }
  0x2e   :  { %p6032_p8 = por %p6031_p7, %p6030_p6 }
  0x30   :  { %p6033_p9 = pnand %p6032_p8, %p6026_p5 }
  0x32   :  { %6036 = shalt.err (!%p6033_p9)
}
  0x33   :  { %42 = dma.hbm_to_vmem [thread:$0]  %s6610_s2, 2048, %s40_s29, [#allocation6]  }
  0x34   :  { %6059 = dma.done.wait [#allocation3], 16  }
  0x35   :  { %6060 = vsyncadd [#allocation3], 4294967280 }
  0x36   :  { %6061 = dma.done.wait [#allocation6], 34816  }
  0x37   :  { %6062 = vsyncadd [#allocation6], 4294932480  ;;  %v6070_v0 = vmov 0   ;;  %v54_v1 = vld [vmem:[#allocation5] sm:$0xff]  ;;  %v55_v3 = vld [vmem:[#allocation5 + $0x8] sm:$0xff]  ;;  %vm2262_vm0 = vcmask 261120  }
  0x38   :  { %2298 = vmatprep.mubr.bf16.mxu0 %v6070_v0  ;;  %2339 = vmatprep.mubr.bf16.mxu1 %v6070_v0  ;;  %v118_v2 = vld [vmem:[#allocation5 + $0x200] sm:$0xff]  ;;  %v119_v5 = vld [vmem:[#allocation5 + $0x208] sm:$0xff]  ;;  %v56_v15 = vld [vmem:[#allocation5 + $0x10] sm:$0xff]  ;;  %s6072_s2 = smov [#allocation8]  }
  0x39   :  { %v5643_v4 = vcombine.high %v54_v1, %v118_v2  ;;  %v5642_v6 = vcombine.low %v54_v1, %v118_v2  ;;  %v182_v7 = vld [vmem:[#allocation5 + $0x400] sm:$0xff]  ;;  %v5645_v9 = vcombine.high %v55_v3, %v119_v5  ;;  %v5644_v10 = vcombine.low %v55_v3, %v119_v5  ;;  %v183_v12 = vld [vmem:[#allocation5 + $0x408] sm:$0xff]  ;;  %v120_v16 = vld [vmem:[#allocation5 + $0x210] sm:$0xff]  ;;  %s5632_s22 = sshll.u32 %s6072_s2, 4  ;;  %s5633_s22 = int_to_ptr.vmem [resolvable:$true] %s5632_s22 }
  0x3a   :  { %v246_v8 = vld [vmem:[#allocation5 + $0x600] sm:$0xff]  ;;  %v247_v13 = vld [vmem:[#allocation5 + $0x608] sm:$0xff]  ;;  %v57_v17 = vld [vmem:[#allocation5 + $0x18] sm:$0xff]  ;;  %v5647_v21 = vcombine.high %v56_v15, %v120_v16  ;;  %v5646_v28 = vcombine.low %v56_v15, %v120_v16  ;;  %s6037_s23 = scalar_lea.vmem %s5633_s22, 4096  ;;  %p6042_p11 = scmp.lt.s32.totalorder %s5633_s22, %s5633_s22 }
  0x3b   :  { %v5771_v11 = vcombine.high %v182_v7, %v246_v8  ;;  %2266 = vmatprep.subr.bf16.mxu0 %v5643_v4  ;;  %v5773_v14 = vcombine.high %v183_v12, %v247_v13  ;;  %2307 = vmatprep.subr.bf16.mxu1 %v5645_v9  ;;  %v5770_v18 = vcombine.low %v182_v7, %v246_v8  ;;  %v121_v19 = vld [vmem:[#allocation5 + $0x218] sm:$0xff]  ;;  %v184_v23 = vld [vmem:[#allocation5 + $0x410] sm:$0xff]  ;;  %v58_v32 = vld [vmem:[#allocation5 + $0x20] sm:$0xff]  ;;  %p6038_p10 = scmp.ne.s32.totalorder %s5633_s22, %s6037_s23  ;;  %p6043_p12 = scmp.lt.s32.totalorder %s6037_s23, %s6037_s23 }
  0x3c   :  { %2267 = vmatpush1.bf16.msra.mxu0 %v5642_v6  ;;  %2308 = vmatpush1.bf16.msra.mxu1 %v5644_v10  ;;  %v5772_v20 = vcombine.low %v183_v12, %v247_v13  ;;  %v5649_v22 = vcombine.high %v57_v17, %v121_v19  ;;  %v248_v24 = vld [vmem:[#allocation5 + $0x610] sm:$0xff]  ;;  %v185_v25 = vld [vmem:[#allocation5 + $0x418] sm:$0xff]  ;;  %v5648_v29 = vcombine.low %v57_v17, %v121_v19  ;;  %v122_v33 = vld [vmem:[#allocation5 + $0x220] sm:$0xff] }
  0x3d   :  { %2268 = vmatprep.subr.bf16.mxu0 %v5771_v11  ;;  %2309 = vmatprep.subr.bf16.mxu1 %v5773_v14  ;;  %v249_v26 = vld [vmem:[#allocation5 + $0x618] sm:$0xff]  ;;  %v5775_v30 = vcombine.high %v184_v23, %v248_v24  ;;  %v59_v34 = vld [vmem:[#allocation5 + $0x28] sm:$0xff]  ;;  %v5774_v36 = vcombine.low %v184_v23, %v248_v24  ;;  %v5651_v38 = vcombine.high %v58_v32, %v122_v33  ;;  %v186_v40 = vld [vmem:[#allocation5 + $0x420] sm:$0xff]  ;;  %p6044_p13 = por %p6043_p12, %p6042_p11 }
  0x3e   :  { %v6131_v27 = vld [vmem:[#allocation2] sm:$0x1]  ;;  %v5777_v31 = vcombine.high %v185_v25, %v249_v26  ;;  %v123_v35 = vld [vmem:[#allocation5 + $0x228] sm:$0xff]  ;;  %v5776_v37 = vcombine.low %v185_v25, %v249_v26  ;;  %v250_v41 = vld [vmem:[#allocation5 + $0x620] sm:$0xff]  ;;  %v5650_v44 = vcombine.low %v58_v32, %v122_v33 }
  0x3f   :  { %v5653_v39 = vcombine.high %v59_v34, %v123_v35  ;;  %v187_v42 = vld [vmem:[#allocation5 + $0x428] sm:$0xff]  ;;  %v5652_v45 = vcombine.low %v59_v34, %v123_v35  ;;  %v5779_v46 = vcombine.high %v186_v40, %v250_v41  ;;  %v60_v48 = vld [vmem:[#allocation5 + $0x30] sm:$0xff]  ;;  %v61_v50 = vld [vmem:[#allocation5 + $0x38] sm:$0xff]  ;;  %v5778_v52 = vcombine.low %v186_v40, %v250_v41  ;;  %p6045_p0 = pnand %p6044_p13, %p6038_p10 }
  0x40   :  { %2269 = vmatpush1.bf16.msra.mxu0 %v5770_v18  ;;  %2310 = vmatpush1.bf16.msra.mxu1 %v5772_v20  ;;  %v251_v43 = vld [vmem:[#allocation5 + $0x628] sm:$0xff]  ;;  %v124_v49 = vld [vmem:[#allocation5 + $0x230] sm:$0xff]  ;;  %v125_v51 = vld [vmem:[#allocation5 + $0x238] sm:$0xff] }
  0x41   :  { %2348 = vmatprep.subr.bf16.mxu0 %v5647_v21  ;;  %2389 = vmatprep.subr.bf16.mxu1 %v5649_v22  ;;  %v5781_v47 = vcombine.high %v187_v42, %v251_v43  ;;  %v5780_v53 = vcombine.low %v187_v42, %v251_v43  ;;  %v5655_v54 = vcombine.high %v60_v48, %v124_v49  ;;  %v188_v56 = vld [vmem:[#allocation5 + $0x430] sm:$0xff]  ;;  %v189_v58 = vld [vmem:[#allocation5 + $0x438] sm:$0xff]  ;;  %v62_v1 = vld [vmem:[#allocation5 + $0x40] sm:$0xff] }
  0x42   :  { %v5657_v55 = vcombine.high %v61_v50, %v125_v51  ;;  %v252_v57 = vld [vmem:[#allocation5 + $0x630] sm:$0xff]  ;;  %v253_v59 = vld [vmem:[#allocation5 + $0x638] sm:$0xff]  ;;  %v5654_v60 = vcombine.low %v60_v48, %v124_v49  ;;  %v5656_v61 = vcombine.low %v61_v50, %v125_v51  ;;  %v126_v2 = vld [vmem:[#allocation5 + $0x240] sm:$0xff] }
  0x43   :  { %5898 = vmatmul.mubr.msk.bf16.vlgmr.msra.gmra.mrb[0].mxu0 %vm2262_vm0, %v6131_v27  ;;  %5899 = vmatmul.mubr.msk.bf16.vlgmr.msra.gmra.mrb[0].mxu1 %vm2262_vm0, %v6131_v27  ;;  %v5783_v62 = vcombine.high %v188_v56, %v252_v57  ;;  %v5785_v63 = vcombine.high %v189_v58, %v253_v59  ;;  %v63_v3 = vld [vmem:[#allocation5 + $0x48] sm:$0xff]  ;;  %v5782_v5 = vcombine.low %v188_v56, %v252_v57  ;;  %v190_v9 = vld [vmem:[#allocation5 + $0x440] sm:$0xff]  ;;  %v64_v17 = vld [vmem:[#allocation5 + $0x50] sm:$0xff] }
  0x44   :  { %2349 = vmatpush1.bf16.msra.mxu0 %v5646_v28  ;;  %2390 = vmatpush1.bf16.msra.mxu1 %v5648_v29  ;;  %v127_v4 = vld [vmem:[#allocation5 + $0x248] sm:$0xff]  ;;  %v5784_v6 = vcombine.low %v189_v58, %v253_v59  ;;  %v5659_v7 = vcombine.high %v62_v1, %v126_v2  ;;  %v254_v10 = vld [vmem:[#allocation5 + $0x640] sm:$0xff]  ;;  %v5658_v13 = vcombine.low %v62_v1, %v126_v2  ;;  %v128_v18 = vld [vmem:[#allocation5 + $0x250] sm:$0xff] }
  0x45   :  { %2350 = vmatprep.subr.bf16.mxu0 %v5775_v30  ;;  %2391 = vmatprep.subr.bf16.mxu1 %v5777_v31  ;;  %v5661_v8 = vcombine.high %v63_v3, %v127_v4  ;;  %v191_v11 = vld [vmem:[#allocation5 + $0x448] sm:$0xff]  ;;  %v5660_v14 = vcombine.low %v63_v3, %v127_v4  ;;  %v5787_v15 = vcombine.high %v190_v9, %v254_v10  ;;  %v65_v19 = vld [vmem:[#allocation5 + $0x58] sm:$0xff]  ;;  %v192_v25 = vld [vmem:[#allocation5 + $0x450] sm:$0xff] }
  0x46   :  { %2380 = vmatprep.mubr.bf16.mxu0 %v6070_v0  ;;  %2421 = vmatprep.mubr.bf16.mxu1 %v6070_v0  ;;  %v255_v12 = vld [vmem:[#allocation5 + $0x648] sm:$0xff]  ;;  %v129_v20 = vld [vmem:[#allocation5 + $0x258] sm:$0xff]  ;;  %v5786_v21 = vcombine.low %v190_v9, %v254_v10  ;;  %v5663_v23 = vcombine.high %v64_v17, %v128_v18  ;;  %v256_v26 = vld [vmem:[#allocation5 + $0x650] sm:$0xff]  ;;  %v5662_v30 = vcombine.low %v64_v17, %v128_v18 }
  0x47   :  { %v5789_v16 = vcombine.high %v191_v11, %v255_v12  ;;  %v5788_v22 = vcombine.low %v191_v11, %v255_v12  ;;  %v5665_v24 = vcombine.high %v65_v19, %v129_v20  ;;  %v193_v28 = vld [vmem:[#allocation5 + $0x458] sm:$0xff]  ;;  %v5664_v31 = vcombine.low %v65_v19, %v129_v20  ;;  %v66_v34 = vld [vmem:[#allocation5 + $0x60] sm:$0xff]  ;;  %v68_v50 = vld [vmem:[#allocation5 + $0x70] sm:$0xff] }
  0x48   :  { %2351 = vmatpush1.bf16.msra.mxu0 %v5774_v36  ;;  %2392 = vmatpush1.bf16.msra.mxu1 %v5776_v37  ;;  %v257_v29 = vld [vmem:[#allocation5 + $0x658] sm:$0xff]  ;;  %v5791_v32 = vcombine.high %v192_v25, %v256_v26  ;;  %v130_v35 = vld [vmem:[#allocation5 + $0x260] sm:$0xff]  ;;  %v67_v36 = vld [vmem:[#allocation5 + $0x68] sm:$0xff] }
  0x49   :  { %2430 = vmatprep.subr.bf16.mxu0 %v5651_v38  ;;  %2471 = vmatprep.subr.bf16.mxu1 %v5653_v39  ;;  %v5793_v33 = vcombine.high %v193_v28, %v257_v29  ;;  %v131_v37 = vld [vmem:[#allocation5 + $0x268] sm:$0xff]  ;;  %v5790_v38 = vcombine.low %v192_v25, %v256_v26  ;;  %v5792_v39 = vcombine.low %v193_v28, %v257_v29  ;;  %v194_v42 = vld [vmem:[#allocation5 + $0x460] sm:$0xff]  ;;  %v132_v51 = vld [vmem:[#allocation5 + $0x270] sm:$0xff] }
  0x4a   :  { %v5667_v40 = vcombine.high %v66_v34, %v130_v35  ;;  %v5669_v41 = vcombine.high %v67_v36, %v131_v37  ;;  %v258_v43 = vld [vmem:[#allocation5 + $0x660] sm:$0xff]  ;;  %v5671_v56 = vcombine.high %v68_v50, %v132_v51  ;;  %v196_v58 = vld [vmem:[#allocation5 + $0x470] sm:$0xff] }
  0x4b   :  { %5900 = vmatmul.mubr.msk.bf16.vlgmr.msra.gmra.mrb[4].mxu0 %vm2262_vm0, %v6131_v27  ;;  %5901 = vmatmul.mubr.msk.bf16.vlgmr.msra.gmra.mrb[4].mxu1 %vm2262_vm0, %v6131_v27  ;;  %v5795_v48 = vcombine.high %v194_v42, %v258_v43  ;;  %v260_v59 = vld [vmem:[#allocation5 + $0x670] sm:$0xff]  ;;  %v70_v3 = vld [vmem:[#allocation5 + $0x80] sm:$0xff] }
  0x4c   :  { %2431 = vmatpush1.bf16.msra.mxu0 %v5650_v44  ;;  %2472 = vmatpush1.bf16.msra.mxu1 %v5652_v45  ;;  %v195_v44 = vld [vmem:[#allocation5 + $0x468] sm:$0xff]  ;;  %v5799_v1 = vcombine.high %v196_v58, %v260_v59  ;;  %v134_v4 = vld [vmem:[#allocation5 + $0x280] sm:$0xff]  ;;  %v72_v19 = vld [vmem:[#allocation5 + $0x90] sm:$0xff] }
  0x4d   :  { %2432 = vmatprep.subr.bf16.mxu0 %v5779_v46  ;;  %2473 = vmatprep.subr.bf16.mxu1 %v5781_v47  ;;  %v259_v45 = vld [vmem:[#allocation5 + $0x668] sm:$0xff]  ;;  %v5666_v46 = vcombine.low %v66_v34, %v130_v35  ;;  %v5668_v47 = vcombine.low %v67_v36, %v131_v37  ;;  %v5675_v9 = vcombine.high %v70_v3, %v134_v4  ;;  %v198_v11 = vld [vmem:[#allocation5 + $0x480] sm:$0xff]  ;;  %v136_v20 = vld [vmem:[#allocation5 + $0x290] sm:$0xff] }
  0x4e   :  { %2462 = vmatprep.mubr.bf16.mxu0 %v6070_v0  ;;  %2503 = vmatprep.mubr.bf16.mxu1 %v6070_v0  ;;  %v5797_v49 = vcombine.high %v195_v44, %v259_v45  ;;  %v262_v12 = vld [vmem:[#allocation5 + $0x680] sm:$0xff]  ;;  %v5679_v25 = vcombine.high %v72_v19, %v136_v20  ;;  %v200_v28 = vld [vmem:[#allocation5 + $0x490] sm:$0xff] }
  0x4f   :  { %v5803_v17 = vcombine.high %v198_v11, %v262_v12  ;;  %v264_v29 = vld [vmem:[#allocation5 + $0x690] sm:$0xff]  ;;  %v74_v36 = vld [vmem:[#allocation5 + $0xa0] sm:$0xff] }
  0x50   :  { %2433 = vmatpush1.bf16.msra.mxu0 %v5778_v52  ;;  %2474 = vmatpush1.bf16.msra.mxu1 %v5780_v53  ;;  %v69_v52 = vld [vmem:[#allocation5 + $0x78] sm:$0xff]  ;;  %v5807_v34 = vcombine.high %v200_v28, %v264_v29  ;;  %v138_v37 = vld [vmem:[#allocation5 + $0x2a0] sm:$0xff] }
  0x51   :  { %2512 = vmatprep.subr.bf16.mxu0 %v5655_v54  ;;  %2553 = vmatprep.subr.bf16.mxu1 %v5657_v55  ;;  %v133_v53 = vld [vmem:[#allocation5 + $0x278] sm:$0xff]  ;;  %v5794_v54 = vcombine.low %v194_v42, %v258_v43  ;;  %v5796_v55 = vcombine.low %v195_v44, %v259_v45  ;;  %v5683_v42 = vcombine.high %v74_v36, %v138_v37  ;;  %v202_v44 = vld [vmem:[#allocation5 + $0x4a0] sm:$0xff] }
  0x52   :  { %v5673_v57 = vcombine.high %v69_v52, %v133_v53  ;;  %v266_v45 = vld [vmem:[#allocation5 + $0x6a0] sm:$0xff] }
  0x53   :  { %5902 = vmatmul.mubr.msk.bf16.vlgmr.msra.gmra.mrb[8].mxu0 %vm2262_vm0, %v6131_v27  ;;  %5903 = vmatmul.mubr.msk.bf16.vlgmr.msra.gmra.mrb[8].mxu1 %vm2262_vm0, %v6131_v27 }
  0x54   :  { %2513 = vmatpush1.bf16.msra.mxu0 %v5654_v60  ;;  %2554 = vmatpush1.bf16.msra.mxu1 %v5656_v61  ;;  %v197_v60 = vld [vmem:[#allocation5 + $0x478] sm:$0xff] }
  0x55   :  { %2514 = vmatprep.subr.bf16.mxu0 %v5783_v62  ;;  %2555 = vmatprep.subr.bf16.mxu1 %v5785_v63  ;;  %v261_v61 = vld [vmem:[#allocation5 + $0x678] sm:$0xff]  ;;  %v5670_v62 = vcombine.low %v68_v50, %v132_v51  ;;  %v5672_v63 = vcombine.low %v69_v52, %v133_v53  ;;  %v5811_v50 = vcombine.high %v202_v44, %v266_v45  ;;  %v76_v52 = vld [vmem:[#allocation5 + $0xb0] sm:$0xff] }
  0x56   :  { %2544 = vmatprep.mubr.bf16.mxu0 %v6070_v0  ;;  %2585 = vmatprep.mubr.bf16.mxu1 %v6070_v0  ;;  %v5801_v2 = vcombine.high %v197_v60, %v261_v61  ;;  %v140_v53 = vld [vmem:[#allocation5 + $0x2b0] sm:$0xff] }
  0x58   :  { %2515 = vmatpush1.bf16.msra.mxu0 %v5782_v5  ;;  %2556 = vmatpush1.bf16.msra.mxu1 %v5784_v6  ;;  %v71_v5 = vld [vmem:[#allocation5 + $0x88] sm:$0xff] }
  0x59   :  { %2594 = vmatprep.subr.bf16.mxu0 %v5659_v7  ;;  %2635 = vmatprep.subr.bf16.mxu1 %v5661_v8  ;;  %v135_v6 = vld [vmem:[#allocation5 + $0x288] sm:$0xff]  ;;  %v5798_v7 = vcombine.low %v196_v58, %v260_v59  ;;  %v5800_v8 = vcombine.low %v197_v60, %v261_v61  ;;  %v5687_v58 = vcombine.high %v76_v52, %v140_v53  ;;  %v204_v60 = vld [vmem:[#allocation5 + $0x4b0] sm:$0xff] }
  0x5a   :  { %v5677_v10 = vcombine.high %v71_v5, %v135_v6  ;;  %v268_v61 = vld [vmem:[#allocation5 + $0x6b0] sm:$0xff] }
  0x5b   :  { %5904 = vmatmul.mubr.msk.bf16.vlgmr.msra.gmra.mrb[12].mxu0 %vm2262_vm0, %v6131_v27  ;;  %5905 = vmatmul.mubr.msk.bf16.vlgmr.msra.gmra.mrb[12].mxu1 %vm2262_vm0, %v6131_v27 }
  0x5c   :  { %2595 = vmatpush1.bf16.msra.mxu0 %v5658_v13  ;;  %2636 = vmatpush1.bf16.msra.mxu1 %v5660_v14  ;;  %v199_v13 = vld [vmem:[#allocation5 + $0x488] sm:$0xff] }
  0x5d   :  { %2596 = vmatprep.subr.bf16.mxu0 %v5787_v15  ;;  %2637 = vmatprep.subr.bf16.mxu1 %v5789_v16  ;;  %v263_v14 = vld [vmem:[#allocation5 + $0x688] sm:$0xff]  ;;  %v5674_v15 = vcombine.low %v70_v3, %v134_v4  ;;  %v5676_v16 = vcombine.low %v71_v5, %v135_v6  ;;  %v5815_v3 = vcombine.high %v204_v60, %v268_v61  ;;  %v78_v5 = vld [vmem:[#allocation5 + $0xc0] sm:$0xff] }
  0x5e   :  { %2626 = vmatprep.mubr.bf16.mxu0 %v6070_v0  ;;  %2667 = vmatprep.mubr.bf16.mxu1 %v6070_v0  ;;  %v5805_v18 = vcombine.high %v199_v13, %v263_v14  ;;  %v142_v6 = vld [vmem:[#allocation5 + $0x2c0] sm:$0xff] }
  0x60   :  { %2597 = vmatpush1.bf16.msra.mxu0 %v5786_v21  ;;  %2638 = vmatpush1.bf16.msra.mxu1 %v5788_v22  ;;  %v73_v21 = vld [vmem:[#allocation5 + $0x98] sm:$0xff] }
  0x61   :  { %2676 = vmatprep.subr.bf16.mxu0 %v5663_v23  ;;  %2717 = vmatprep.subr.bf16.mxu1 %v5665_v24  ;;  %v137_v22 = vld [vmem:[#allocation5 + $0x298] sm:$0xff]  ;;  %v5802_v23 = vcombine.low %v198_v11, %v262_v12  ;;  %v5804_v24 = vcombine.low %v199_v13, %v263_v14  ;;  %v5691_v11 = vcombine.high %v78_v5, %v142_v6  ;;  %v206_v13 = vld [vmem:[#allocation5 + $0x4c0] sm:$0xff] }
  0x62   :  { %v5681_v26 = vcombine.high %v73_v21, %v137_v22  ;;  %v270_v14 = vld [vmem:[#allocation5 + $0x6c0] sm:$0xff] }
  0x63   :  { %5906 = vmatmul.mubr.msk.bf16.vlgmr.msra.gmra.mrb[16].mxu0 %vm2262_vm0, %v6131_v27  ;;  %5907 = vmatmul.mubr.msk.bf16.vlgmr.msra.gmra.mrb[16].mxu1 %vm2262_vm0, %v6131_v27 }
  0x64   :  { %2677 = vmatpush1.bf16.msra.mxu0 %v5662_v30  ;;  %2718 = vmatpush1.bf16.msra.mxu1 %v5664_v31  ;;  %v201_v30 = vld [vmem:[#allocation5 + $0x498] sm:$0xff] }
  0x65   :  { %2678 = vmatprep.subr.bf16.mxu0 %v5791_v32  ;;  %2719 = vmatprep.subr.bf16.mxu1 %v5793_v33  ;;  %v265_v31 = vld [vmem:[#allocation5 + $0x698] sm:$0xff]  ;;  %v5678_v32 = vcombine.low %v72_v19, %v136_v20  ;;  %v5680_v33 = vcombine.low %v73_v21, %v137_v22  ;;  %v5819_v19 = vcombine.high %v206_v13, %v270_v14  ;;  %v80_v21 = vld [vmem:[#allocation5 + $0xd0] sm:$0xff] }
  0x66   :  { %2708 = vmatprep.mubr.bf16.mxu0 %v6070_v0  ;;  %2749 = vmatprep.mubr.bf16.mxu1 %v6070_v0  ;;  %v5809_v35 = vcombine.high %v201_v30, %v265_v31  ;;  %v144_v22 = vld [vmem:[#allocation5 + $0x2d0] sm:$0xff] }
  0x68   :  { %2679 = vmatpush1.bf16.msra.mxu0 %v5790_v38  ;;  %2720 = vmatpush1.bf16.msra.mxu1 %v5792_v39  ;;  %v75_v38 = vld [vmem:[#allocation5 + $0xa8] sm:$0xff] }
  0x69   :  { %2758 = vmatprep.subr.bf16.mxu0 %v5667_v40  ;;  %2799 = vmatprep.subr.bf16.mxu1 %v5669_v41  ;;  %v139_v39 = vld [vmem:[#allocation5 + $0x2a8] sm:$0xff]  ;;  %v5806_v40 = vcombine.low %v200_v28, %v264_v29  ;;  %v5808_v41 = vcombine.low %v201_v30, %v265_v31  ;;  %v5695_v28 = vcombine.high %v80_v21, %v144_v22  ;;  %v208_v30 = vld [vmem:[#allocation5 + $0x4d0] sm:$0xff] }
  0x6a   :  { %v5685_v43 = vcombine.high %v75_v38, %v139_v39  ;;  %v272_v31 = vld [vmem:[#allocation5 + $0x6d0] sm:$0xff] }
  0x6b   :  { %5908 = vmatmul.mubr.msk.bf16.vlgmr.msra.gmra.mrb[20].mxu0 %vm2262_vm0, %v6131_v27  ;;  %5909 = vmatmul.mubr.msk.bf16.vlgmr.msra.gmra.mrb[20].mxu1 %vm2262_vm0, %v6131_v27 }
  0x6c   :  { %2759 = vmatpush1.bf16.msra.mxu0 %v5666_v46  ;;  %2800 = vmatpush1.bf16.msra.mxu1 %v5668_v47  ;;  %v203_v46 = vld [vmem:[#allocation5 + $0x4a8] sm:$0xff] }
  0x6d   :  { %2760 = vmatprep.subr.bf16.mxu0 %v5795_v48  ;;  %2801 = vmatprep.subr.bf16.mxu1 %v5797_v49  ;;  %v267_v47 = vld [vmem:[#allocation5 + $0x6a8] sm:$0xff]  ;;  %v5682_v48 = vcombine.low %v74_v36, %v138_v37  ;;  %v5684_v49 = vcombine.low %v75_v38, %v139_v39  ;;  %v5823_v36 = vcombine.high %v208_v30, %v272_v31  ;;  %v82_v38 = vld [vmem:[#allocation5 + $0xe0] sm:$0xff] }
  0x6e   :  { %2790 = vmatprep.mubr.bf16.mxu0 %v6070_v0  ;;  %2831 = vmatprep.mubr.bf16.mxu1 %v6070_v0  ;;  %v5813_v51 = vcombine.high %v203_v46, %v267_v47  ;;  %v146_v39 = vld [vmem:[#allocation5 + $0x2e0] sm:$0xff] }
  0x70   :  { %2761 = vmatpush1.bf16.msra.mxu0 %v5794_v54  ;;  %2802 = vmatpush1.bf16.msra.mxu1 %v5796_v55  ;;  %v77_v54 = vld [vmem:[#allocation5 + $0xb8] sm:$0xff] }
  0x71   :  { %2840 = vmatprep.subr.bf16.mxu0 %v5671_v56  ;;  %2881 = vmatprep.subr.bf16.mxu1 %v5673_v57  ;;  %v141_v55 = vld [vmem:[#allocation5 + $0x2b8] sm:$0xff]  ;;  %v5810_v56 = vcombine.low %v202_v44, %v266_v45  ;;  %v5812_v57 = vcombine.low %v203_v46, %v267_v47  ;;  %v5699_v44 = vcombine.high %v82_v38, %v146_v39  ;;  %v210_v46 = vld [vmem:[#allocation5 + $0x4e0] sm:$0xff] }
  0x72   :  { %v5689_v59 = vcombine.high %v77_v54, %v141_v55  ;;  %v274_v47 = vld [vmem:[#allocation5 + $0x6e0] sm:$0xff] }
  0x73   :  { %5910 = vmatmul.mubr.msk.bf16.vlgmr.msra.gmra.mrb[24].mxu0 %vm2262_vm0, %v6131_v27  ;;  %5911 = vmatmul.mubr.msk.bf16.vlgmr.msra.gmra.mrb[24].mxu1 %vm2262_vm0, %v6131_v27 }
  0x74   :  { %2841 = vmatpush1.bf16.msra.mxu0 %v5670_v62  ;;  %2882 = vmatpush1.bf16.msra.mxu1 %v5672_v63  ;;  %v205_v62 = vld [vmem:[#allocation5 + $0x4b8] sm:$0xff] }
  0x75   :  { %2842 = vmatprep.subr.bf16.mxu0 %v5799_v1  ;;  %2883 = vmatprep.subr.bf16.mxu1 %v5801_v2  ;;  %v269_v63 = vld [vmem:[#allocation5 + $0x6b8] sm:$0xff]  ;;  %v5686_v1 = vcombine.low %v76_v52, %v140_v53  ;;  %v5688_v2 = vcombine.low %v77_v54, %v141_v55  ;;  %v5827_v52 = vcombine.high %v210_v46, %v274_v47  ;;  %v84_v54 = vld [vmem:[#allocation5 + $0xf0] sm:$0xff] }
  0x76   :  { %2872 = vmatprep.mubr.bf16.mxu0 %v6070_v0  ;;  %2913 = vmatprep.mubr.bf16.mxu1 %v6070_v0  ;;  %v5817_v4 = vcombine.high %v205_v62, %v269_v63  ;;  %v148_v55 = vld [vmem:[#allocation5 + $0x2f0] sm:$0xff] }
  0x78   :  { %2843 = vmatpush1.bf16.msra.mxu0 %v5798_v7  ;;  %2884 = vmatpush1.bf16.msra.mxu1 %v5800_v8  ;;  %v79_v7 = vld [vmem:[#allocation5 + $0xc8] sm:$0xff] }
  0x79   :  { %2922 = vmatprep.subr.bf16.mxu0 %v5675_v9  ;;  %2963 = vmatprep.subr.bf16.mxu1 %v5677_v10  ;;  %v143_v8 = vld [vmem:[#allocation5 + $0x2c8] sm:$0xff]  ;;  %v5814_v9 = vcombine.low %v204_v60, %v268_v61  ;;  %v5816_v10 = vcombine.low %v205_v62, %v269_v63  ;;  %v5703_v60 = vcombine.high %v84_v54, %v148_v55  ;;  %v212_v62 = vld [vmem:[#allocation5 + $0x4f0] sm:$0xff] }
  0x7a   :  { %v5693_v12 = vcombine.high %v79_v7, %v143_v8  ;;  %v276_v63 = vld [vmem:[#allocation5 + $0x6f0] sm:$0xff] }
  0x7b   :  { %5912 = vmatmul.mubr.msk.bf16.vlgmr.msra.gmra.mrb[28].mxu0 %vm2262_vm0, %v6131_v27  ;;  %5913 = vmatmul.mubr.msk.bf16.vlgmr.msra.gmra.mrb[28].mxu1 %vm2262_vm0, %v6131_v27 }
  0x7c   :  { %2923 = vmatpush1.bf16.msra.mxu0 %v5674_v15  ;;  %2964 = vmatpush1.bf16.msra.mxu1 %v5676_v16  ;;  %v207_v15 = vld [vmem:[#allocation5 + $0x4c8] sm:$0xff] }
  0x7d   :  { %2924 = vmatprep.subr.bf16.mxu0 %v5803_v17  ;;  %2965 = vmatprep.subr.bf16.mxu1 %v5805_v18  ;;  %v271_v16 = vld [vmem:[#allocation5 + $0x6c8] sm:$0xff]  ;;  %v5690_v17 = vcombine.low %v78_v5, %v142_v6  ;;  %v5692_v18 = vcombine.low %v79_v7, %v143_v8  ;;  %v5831_v5 = vcombine.high %v212_v62, %v276_v63  ;;  %v86_v7 = vld [vmem:[#allocation5 + $0x100] sm:$0xff] }
  0x7e   :  { %2954 = vmatprep.mubr.bf16.mxu0 %v6070_v0  ;;  %2995 = vmatprep.mubr.bf16.mxu1 %v6070_v0  ;;  %v5821_v20 = vcombine.high %v207_v15, %v271_v16  ;;  %v150_v8 = vld [vmem:[#allocation5 + $0x300] sm:$0xff] }
  0x80   :  { %2925 = vmatpush1.bf16.msra.mxu0 %v5802_v23  ;;  %2966 = vmatpush1.bf16.msra.mxu1 %v5804_v24  ;;  %v81_v23 = vld [vmem:[#allocation5 + $0xd8] sm:$0xff] }
  0x81   :  { %3004 = vmatprep.subr.bf16.mxu0 %v5679_v25  ;;  %3045 = vmatprep.subr.bf16.mxu1 %v5681_v26  ;;  %v145_v24 = vld [vmem:[#allocation5 + $0x2d8] sm:$0xff]  ;;  %v5818_v25 = vcombine.low %v206_v13, %v270_v14  ;;  %v5820_v26 = vcombine.low %v207_v15, %v271_v16  ;;  %v5707_v13 = vcombine.high %v86_v7, %v150_v8  ;;  %v214_v15 = vld [vmem:[#allocation5 + $0x500] sm:$0xff] }
  0x82   :  { %v5697_v29 = vcombine.high %v81_v23, %v145_v24  ;;  %v278_v16 = vld [vmem:[#allocation5 + $0x700] sm:$0xff] }
  0x83   :  { %5914 = vmatmul.mubr.msk.bf16.vlgmr.msra.gmra.mrb[32].mxu0 %vm2262_vm0, %v6131_v27  ;;  %5915 = vmatmul.mubr.msk.bf16.vlgmr.msra.gmra.mrb[32].mxu1 %vm2262_vm0, %v6131_v27 }
  0x84   :  { %3005 = vmatpush1.bf16.msra.mxu0 %v5678_v32  ;;  %3046 = vmatpush1.bf16.msra.mxu1 %v5680_v33  ;;  %v209_v32 = vld [vmem:[#allocation5 + $0x4d8] sm:$0xff] }
  0x85   :  { %3006 = vmatprep.subr.bf16.mxu0 %v5807_v34  ;;  %3047 = vmatprep.subr.bf16.mxu1 %v5809_v35  ;;  %v273_v33 = vld [vmem:[#allocation5 + $0x6d8] sm:$0xff]  ;;  %v5694_v34 = vcombine.low %v80_v21, %v144_v22  ;;  %v5696_v35 = vcombine.low %v81_v23, %v145_v24  ;;  %v5835_v21 = vcombine.high %v214_v15, %v278_v16  ;;  %v88_v23 = vld [vmem:[#allocation5 + $0x110] sm:$0xff] }
  0x86   :  { %3036 = vmatprep.mubr.bf16.mxu0 %v6070_v0  ;;  %3077 = vmatprep.mubr.bf16.mxu1 %v6070_v0  ;;  %v5825_v37 = vcombine.high %v209_v32, %v273_v33  ;;  %v152_v24 = vld [vmem:[#allocation5 + $0x310] sm:$0xff] }
  0x88   :  { %3007 = vmatpush1.bf16.msra.mxu0 %v5806_v40  ;;  %3048 = vmatpush1.bf16.msra.mxu1 %v5808_v41  ;;  %v83_v40 = vld [vmem:[#allocation5 + $0xe8] sm:$0xff] }
  0x89   :  { %3086 = vmatprep.subr.bf16.mxu0 %v5683_v42  ;;  %3127 = vmatprep.subr.bf16.mxu1 %v5685_v43  ;;  %v147_v41 = vld [vmem:[#allocation5 + $0x2e8] sm:$0xff]  ;;  %v5822_v42 = vcombine.low %v208_v30, %v272_v31  ;;  %v5824_v43 = vcombine.low %v209_v32, %v273_v33  ;;  %v5711_v30 = vcombine.high %v88_v23, %v152_v24  ;;  %v216_v32 = vld [vmem:[#allocation5 + $0x510] sm:$0xff] }
  0x8a   :  { %v5701_v45 = vcombine.high %v83_v40, %v147_v41  ;;  %v280_v33 = vld [vmem:[#allocation5 + $0x710] sm:$0xff] }
  0x8b   :  { %5916 = vmatmul.mubr.msk.bf16.vlgmr.msra.gmra.mrb[36].mxu0 %vm2262_vm0, %v6131_v27  ;;  %5917 = vmatmul.mubr.msk.bf16.vlgmr.msra.gmra.mrb[36].mxu1 %vm2262_vm0, %v6131_v27 }
  0x8c   :  { %3087 = vmatpush1.bf16.msra.mxu0 %v5682_v48  ;;  %3128 = vmatpush1.bf16.msra.mxu1 %v5684_v49  ;;  %v211_v48 = vld [vmem:[#allocation5 + $0x4e8] sm:$0xff] }
  0x8d   :  { %3088 = vmatprep.subr.bf16.mxu0 %v5811_v50  ;;  %3129 = vmatprep.subr.bf16.mxu1 %v5813_v51  ;;  %v275_v49 = vld [vmem:[#allocation5 + $0x6e8] sm:$0xff]  ;;  %v5698_v50 = vcombine.low %v82_v38, %v146_v39  ;;  %v5700_v51 = vcombine.low %v83_v40, %v147_v41  ;;  %v5839_v38 = vcombine.high %v216_v32, %v280_v33  ;;  %v90_v40 = vld [vmem:[#allocation5 + $0x120] sm:$0xff] }
  0x8e   :  { %3118 = vmatprep.mubr.bf16.mxu0 %v6070_v0  ;;  %3159 = vmatprep.mubr.bf16.mxu1 %v6070_v0  ;;  %v5829_v53 = vcombine.high %v211_v48, %v275_v49  ;;  %v154_v41 = vld [vmem:[#allocation5 + $0x320] sm:$0xff] }
  0x90   :  { %3089 = vmatpush1.bf16.msra.mxu0 %v5810_v56  ;;  %3130 = vmatpush1.bf16.msra.mxu1 %v5812_v57  ;;  %v85_v56 = vld [vmem:[#allocation5 + $0xf8] sm:$0xff] }
  0x91   :  { %3168 = vmatprep.subr.bf16.mxu0 %v5687_v58  ;;  %3209 = vmatprep.subr.bf16.mxu1 %v5689_v59  ;;  %v149_v57 = vld [vmem:[#allocation5 + $0x2f8] sm:$0xff]  ;;  %v5826_v58 = vcombine.low %v210_v46, %v274_v47  ;;  %v5828_v59 = vcombine.low %v211_v48, %v275_v49  ;;  %v5715_v46 = vcombine.high %v90_v40, %v154_v41  ;;  %v218_v48 = vld [vmem:[#allocation5 + $0x520] sm:$0xff] }
  0x92   :  { %v5705_v61 = vcombine.high %v85_v56, %v149_v57  ;;  %v282_v49 = vld [vmem:[#allocation5 + $0x720] sm:$0xff] }
  0x93   :  { %5918 = vmatmul.mubr.msk.bf16.vlgmr.msra.gmra.mrb[40].mxu0 %vm2262_vm0, %v6131_v27  ;;  %5919 = vmatmul.mubr.msk.bf16.vlgmr.msra.gmra.mrb[40].mxu1 %vm2262_vm0, %v6131_v27 }
  0x94   :  { %3169 = vmatpush1.bf16.msra.mxu0 %v5686_v1  ;;  %3210 = vmatpush1.bf16.msra.mxu1 %v5688_v2  ;;  %v213_v1 = vld [vmem:[#allocation5 + $0x4f8] sm:$0xff] }
  0x95   :  { %3170 = vmatprep.subr.bf16.mxu0 %v5815_v3  ;;  %3211 = vmatprep.subr.bf16.mxu1 %v5817_v4  ;;  %v277_v2 = vld [vmem:[#allocation5 + $0x6f8] sm:$0xff]  ;;  %v5702_v3 = vcombine.low %v84_v54, %v148_v55  ;;  %v5704_v4 = vcombine.low %v85_v56, %v149_v57  ;;  %v5843_v54 = vcombine.high %v218_v48, %v282_v49  ;;  %v92_v56 = vld [vmem:[#allocation5 + $0x130] sm:$0xff] }
  0x96   :  { %3200 = vmatprep.mubr.bf16.mxu0 %v6070_v0  ;;  %3241 = vmatprep.mubr.bf16.mxu1 %v6070_v0  ;;  %v5833_v6 = vcombine.high %v213_v1, %v277_v2  ;;  %v156_v57 = vld [vmem:[#allocation5 + $0x330] sm:$0xff] }
  0x98   :  { %3171 = vmatpush1.bf16.msra.mxu0 %v5814_v9  ;;  %3212 = vmatpush1.bf16.msra.mxu1 %v5816_v10  ;;  %v87_v9 = vld [vmem:[#allocation5 + $0x108] sm:$0xff] }
  0x99   :  { %3250 = vmatprep.subr.bf16.mxu0 %v5691_v11  ;;  %3291 = vmatprep.subr.bf16.mxu1 %v5693_v12  ;;  %v151_v10 = vld [vmem:[#allocation5 + $0x308] sm:$0xff]  ;;  %v5830_v11 = vcombine.low %v212_v62, %v276_v63  ;;  %v5832_v12 = vcombine.low %v213_v1, %v277_v2  ;;  %v5719_v62 = vcombine.high %v92_v56, %v156_v57  ;;  %v220_v1 = vld [vmem:[#allocation5 + $0x530] sm:$0xff] }
  0x9a   :  { %v5709_v14 = vcombine.high %v87_v9, %v151_v10  ;;  %v284_v2 = vld [vmem:[#allocation5 + $0x730] sm:$0xff] }
  0x9b   :  { %5920 = vmatmul.mubr.msk.bf16.vlgmr.msra.gmra.mrb[44].mxu0 %vm2262_vm0, %v6131_v27  ;;  %5921 = vmatmul.mubr.msk.bf16.vlgmr.msra.gmra.mrb[44].mxu1 %vm2262_vm0, %v6131_v27 }
  0x9c   :  { %3251 = vmatpush1.bf16.msra.mxu0 %v5690_v17  ;;  %3292 = vmatpush1.bf16.msra.mxu1 %v5692_v18  ;;  %v215_v17 = vld [vmem:[#allocation5 + $0x508] sm:$0xff] }
  0x9d   :  { %3252 = vmatprep.subr.bf16.mxu0 %v5819_v19  ;;  %3293 = vmatprep.subr.bf16.mxu1 %v5821_v20  ;;  %v279_v18 = vld [vmem:[#allocation5 + $0x708] sm:$0xff]  ;;  %v5706_v19 = vcombine.low %v86_v7, %v150_v8  ;;  %v5708_v20 = vcombine.low %v87_v9, %v151_v10  ;;  %v94_v8 = vld [vmem:[#allocation5 + $0x140] sm:$0xff]  ;;  %v6241_v10 = vld [vmem:[#allocation2] sm:$0x1] }
  0x9e   :  { %3282 = vmatprep.mubr.bf16.mxu0 %v6070_v0  ;;  %3323 = vmatprep.mubr.bf16.mxu1 %v6070_v0  ;;  %v5837_v22 = vcombine.high %v215_v17, %v279_v18  ;;  %v158_v9 = vld [vmem:[#allocation5 + $0x340] sm:$0xff] }
  0xa0   :  { %3253 = vmatpush1.bf16.msra.mxu0 %v5818_v25  ;;  %3294 = vmatpush1.bf16.msra.mxu1 %v5820_v26  ;;  %v89_v25 = vld [vmem:[#allocation5 + $0x118] sm:$0xff] }
  0xa1   :  { %3332 = vmatprep.subr.bf16.mxu0 %v5695_v28  ;;  %3373 = vmatprep.subr.bf16.mxu1 %v5697_v29  ;;  %v153_v26 = vld [vmem:[#allocation5 + $0x318] sm:$0xff]  ;;  %v5834_v28 = vcombine.low %v214_v15, %v278_v16  ;;  %v5836_v29 = vcombine.low %v215_v17, %v279_v18  ;;  %v5723_v15 = vcombine.high %v94_v8, %v158_v9  ;;  %v222_v17 = vld [vmem:[#allocation5 + $0x540] sm:$0xff] }
  0xa2   :  { %v5713_v31 = vcombine.high %v89_v25, %v153_v26  ;;  %v286_v18 = vld [vmem:[#allocation5 + $0x740] sm:$0xff] }
  0xa3   :  { %5922 = vmatmul.mubr.msk.bf16.vlgmr.msra.gmra.mrb[48].mxu0 %vm2262_vm0, %v6131_v27  ;;  %5923 = vmatmul.mubr.msk.bf16.vlgmr.msra.gmra.mrb[48].mxu1 %vm2262_vm0, %v6131_v27 }
  0xa4   :  { %3333 = vmatpush1.bf16.msra.mxu0 %v5694_v34  ;;  %3374 = vmatpush1.bf16.msra.mxu1 %v5696_v35  ;;  %v217_v34 = vld [vmem:[#allocation5 + $0x518] sm:$0xff] }
  0xa5   :  { %3334 = vmatprep.subr.bf16.mxu0 %v5823_v36  ;;  %3375 = vmatprep.subr.bf16.mxu1 %v5825_v37  ;;  %v281_v35 = vld [vmem:[#allocation5 + $0x718] sm:$0xff]  ;;  %v5710_v36 = vcombine.low %v88_v23, %v152_v24  ;;  %v5712_v37 = vcombine.low %v89_v25, %v153_v26  ;;  %v5851_v23 = vcombine.high %v222_v17, %v286_v18  ;;  %v96_v25 = vld [vmem:[#allocation5 + $0x150] sm:$0xff] }
  0xa6   :  { %3364 = vmatprep.mubr.bf16.mxu0 %v6070_v0  ;;  %3405 = vmatprep.mubr.bf16.mxu1 %v6070_v0  ;;  %v5841_v39 = vcombine.high %v217_v34, %v281_v35  ;;  %v160_v26 = vld [vmem:[#allocation5 + $0x350] sm:$0xff] }
  0xa8   :  { %3335 = vmatpush1.bf16.msra.mxu0 %v5822_v42  ;;  %3376 = vmatpush1.bf16.msra.mxu1 %v5824_v43  ;;  %v91_v42 = vld [vmem:[#allocation5 + $0x128] sm:$0xff] }
  0xa9   :  { %3414 = vmatprep.subr.bf16.mxu0 %v5699_v44  ;;  %3455 = vmatprep.subr.bf16.mxu1 %v5701_v45  ;;  %v155_v43 = vld [vmem:[#allocation5 + $0x328] sm:$0xff]  ;;  %v5838_v44 = vcombine.low %v216_v32, %v280_v33  ;;  %v5840_v45 = vcombine.low %v217_v34, %v281_v35  ;;  %v5727_v32 = vcombine.high %v96_v25, %v160_v26  ;;  %v224_v34 = vld [vmem:[#allocation5 + $0x550] sm:$0xff] }
  0xaa   :  { %v5717_v47 = vcombine.high %v91_v42, %v155_v43  ;;  %v288_v35 = vld [vmem:[#allocation5 + $0x750] sm:$0xff] }
  0xab   :  { %5924 = vmatmul.mubr.msk.bf16.vlgmr.msra.gmra.mrb[52].mxu0 %vm2262_vm0, %v6131_v27  ;;  %5925 = vmatmul.mubr.msk.bf16.vlgmr.msra.gmra.mrb[52].mxu1 %vm2262_vm0, %v6131_v27 }
  0xac   :  { %3415 = vmatpush1.bf16.msra.mxu0 %v5698_v50  ;;  %3456 = vmatpush1.bf16.msra.mxu1 %v5700_v51  ;;  %v219_v50 = vld [vmem:[#allocation5 + $0x528] sm:$0xff] }
  0xad   :  { %3416 = vmatprep.subr.bf16.mxu0 %v5827_v52  ;;  %3457 = vmatprep.subr.bf16.mxu1 %v5829_v53  ;;  %v283_v51 = vld [vmem:[#allocation5 + $0x728] sm:$0xff]  ;;  %v5714_v52 = vcombine.low %v90_v40, %v154_v41  ;;  %v5716_v53 = vcombine.low %v91_v42, %v155_v43  ;;  %v5855_v40 = vcombine.high %v224_v34, %v288_v35  ;;  %v98_v42 = vld [vmem:[#allocation5 + $0x160] sm:$0xff] }
  0xae   :  { %3446 = vmatprep.mubr.bf16.mxu0 %v6070_v0  ;;  %3487 = vmatprep.mubr.bf16.mxu1 %v6070_v0  ;;  %v5845_v55 = vcombine.high %v219_v50, %v283_v51  ;;  %v162_v43 = vld [vmem:[#allocation5 + $0x360] sm:$0xff] }
  0xb0   :  { %3417 = vmatpush1.bf16.msra.mxu0 %v5826_v58  ;;  %3458 = vmatpush1.bf16.msra.mxu1 %v5828_v59  ;;  %v93_v58 = vld [vmem:[#allocation5 + $0x138] sm:$0xff] }
  0xb1   :  { %3496 = vmatprep.subr.bf16.mxu0 %v5703_v60  ;;  %3537 = vmatprep.subr.bf16.mxu1 %v5705_v61  ;;  %v157_v59 = vld [vmem:[#allocation5 + $0x338] sm:$0xff]  ;;  %v5842_v60 = vcombine.low %v218_v48, %v282_v49  ;;  %v5844_v61 = vcombine.low %v219_v50, %v283_v51  ;;  %v5731_v48 = vcombine.high %v98_v42, %v162_v43  ;;  %v226_v50 = vld [vmem:[#allocation5 + $0x560] sm:$0xff] }
  0xb2   :  { %v5721_v63 = vcombine.high %v93_v58, %v157_v59  ;;  %v290_v51 = vld [vmem:[#allocation5 + $0x760] sm:$0xff] }
  0xb3   :  { %5926 = vmatmul.mubr.msk.bf16.vlgmr.msra.gmra.mrb[56].mxu0 %vm2262_vm0, %v6131_v27  ;;  %5927 = vmatmul.mubr.msk.bf16.vlgmr.msra.gmra.mrb[56].mxu1 %vm2262_vm0, %v6131_v27 }
  0xb4   :  { %3497 = vmatpush1.bf16.msra.mxu0 %v5702_v3  ;;  %3538 = vmatpush1.bf16.msra.mxu1 %v5704_v4  ;;  %v221_v3 = vld [vmem:[#allocation5 + $0x538] sm:$0xff] }
  0xb5   :  { %3498 = vmatprep.subr.bf16.mxu0 %v5831_v5  ;;  %3539 = vmatprep.subr.bf16.mxu1 %v5833_v6  ;;  %v285_v4 = vld [vmem:[#allocation5 + $0x738] sm:$0xff]  ;;  %v5718_v5 = vcombine.low %v92_v56, %v156_v57  ;;  %v5847_v6 = vcombine.high %v220_v1, %v284_v2  ;;  %v5859_v56 = vcombine.high %v226_v50, %v290_v51 }
  0xb6   :  { %3528 = vmatprep.mubr.bf16.mxu0 %v6070_v0  ;;  %3569 = vmatprep.mubr.bf16.mxu1 %v6070_v0  ;;  %v5849_v7 = vcombine.high %v221_v3, %v285_v4 }
  0xb8   :  { %3499 = vmatpush1.bf16.msra.mxu0 %v5830_v11  ;;  %3540 = vmatpush1.bf16.msra.mxu1 %v5832_v12  ;;  %v95_v11 = vld [vmem:[#allocation5 + $0x148] sm:$0xff] }
  0xb9   :  { %3578 = vmatprep.subr.bf16.mxu0 %v5707_v13  ;;  %3619 = vmatprep.subr.bf16.mxu1 %v5709_v14  ;;  %v159_v12 = vld [vmem:[#allocation5 + $0x348] sm:$0xff]  ;;  %v5846_v13 = vcombine.low %v220_v1, %v284_v2  ;;  %v5848_v14 = vcombine.low %v221_v3, %v285_v4  ;;  %v228_v3 = vld [vmem:[#allocation5 + $0x570] sm:$0xff] }
  0xba   :  { %v5725_v16 = vcombine.high %v95_v11, %v159_v12  ;;  %v292_v4 = vld [vmem:[#allocation5 + $0x770] sm:$0xff] }
  0xbb   :  { %5928 = vmatmul.mubr.msk.bf16.vlgmr.msra.gmra.mrb[60].mxu0 %vm2262_vm0, %v6131_v27  ;;  %5929 = vmatmul.mubr.msk.bf16.vlgmr.msra.gmra.mrb[60].mxu1 %vm2262_vm0, %v6131_v27 }
  0xbc   :  { %3579 = vmatpush1.bf16.msra.mxu0 %v5706_v19  ;;  %3620 = vmatpush1.bf16.msra.mxu1 %v5708_v20  ;;  %v223_v19 = vld [vmem:[#allocation5 + $0x548] sm:$0xff] }
  0xbd   :  { %3580 = vmatprep.subr.bf16.mxu0 %v5835_v21  ;;  %3621 = vmatprep.subr.bf16.mxu1 %v5837_v22  ;;  %v287_v20 = vld [vmem:[#allocation5 + $0x748] sm:$0xff]  ;;  %v5722_v21 = vcombine.low %v94_v8, %v158_v9  ;;  %v5724_v22 = vcombine.low %v95_v11, %v159_v12  ;;  %v5863_v8 = vcombine.high %v228_v3, %v292_v4  ;;  %v102_v11 = vld [vmem:[#allocation5 + $0x180] sm:$0xff] }
  0xbe   :  { %3610 = vmatprep.mubr.bf16.mxu0 %v6070_v0  ;;  %3651 = vmatprep.mubr.bf16.mxu1 %v6070_v0  ;;  %v5853_v24 = vcombine.high %v223_v19, %v287_v20  ;;  %v166_v12 = vld [vmem:[#allocation5 + $0x380] sm:$0xff] }
  0xc0   :  { %3581 = vmatpush1.bf16.msra.mxu0 %v5834_v28  ;;  %3622 = vmatpush1.bf16.msra.mxu1 %v5836_v29  ;;  %v97_v28 = vld [vmem:[#allocation5 + $0x158] sm:$0xff] }
  0xc1   :  { %3660 = vmatprep.subr.bf16.mxu0 %v5711_v30  ;;  %3701 = vmatprep.subr.bf16.mxu1 %v5713_v31  ;;  %v161_v29 = vld [vmem:[#allocation5 + $0x358] sm:$0xff]  ;;  %v5850_v30 = vcombine.low %v222_v17, %v286_v18  ;;  %v5852_v31 = vcombine.low %v223_v19, %v287_v20  ;;  %v5739_v17 = vcombine.high %v102_v11, %v166_v12  ;;  %v230_v19 = vld [vmem:[#allocation5 + $0x580] sm:$0xff] }
  0xc2   :  { %v5729_v33 = vcombine.high %v97_v28, %v161_v29  ;;  %v294_v20 = vld [vmem:[#allocation5 + $0x780] sm:$0xff] }
  0xc3   :  { %5930 = vmatmul.mubr.msk.bf16.vlgmr.msra.gmra.mrb[64].mxu0 %vm2262_vm0, %v6131_v27  ;;  %5931 = vmatmul.mubr.msk.bf16.vlgmr.msra.gmra.mrb[64].mxu1 %vm2262_vm0, %v6131_v27 }
  0xc4   :  { %3661 = vmatpush1.bf16.msra.mxu0 %v5710_v36  ;;  %3702 = vmatpush1.bf16.msra.mxu1 %v5712_v37  ;;  %v225_v36 = vld [vmem:[#allocation5 + $0x558] sm:$0xff] }
  0xc5   :  { %3662 = vmatprep.subr.bf16.mxu0 %v5839_v38  ;;  %3703 = vmatprep.subr.bf16.mxu1 %v5841_v39  ;;  %v289_v37 = vld [vmem:[#allocation5 + $0x758] sm:$0xff]  ;;  %v5726_v38 = vcombine.low %v96_v25, %v160_v26  ;;  %v5728_v39 = vcombine.low %v97_v28, %v161_v29  ;;  %v5867_v25 = vcombine.high %v230_v19, %v294_v20  ;;  %v104_v28 = vld [vmem:[#allocation5 + $0x190] sm:$0xff] }
  0xc6   :  { %3692 = vmatprep.mubr.bf16.mxu0 %v6070_v0  ;;  %3733 = vmatprep.mubr.bf16.mxu1 %v6070_v0  ;;  %v5857_v41 = vcombine.high %v225_v36, %v289_v37  ;;  %v168_v29 = vld [vmem:[#allocation5 + $0x390] sm:$0xff] }
  0xc8   :  { %3663 = vmatpush1.bf16.msra.mxu0 %v5838_v44  ;;  %3704 = vmatpush1.bf16.msra.mxu1 %v5840_v45  ;;  %v99_v44 = vld [vmem:[#allocation5 + $0x168] sm:$0xff] }
  0xc9   :  { %3742 = vmatprep.subr.bf16.mxu0 %v5715_v46  ;;  %3783 = vmatprep.subr.bf16.mxu1 %v5717_v47  ;;  %v163_v45 = vld [vmem:[#allocation5 + $0x368] sm:$0xff]  ;;  %v5854_v46 = vcombine.low %v224_v34, %v288_v35  ;;  %v5856_v47 = vcombine.low %v225_v36, %v289_v37  ;;  %v5743_v34 = vcombine.high %v104_v28, %v168_v29  ;;  %v232_v36 = vld [vmem:[#allocation5 + $0x590] sm:$0xff] }
  0xca   :  { %v5733_v49 = vcombine.high %v99_v44, %v163_v45  ;;  %v296_v37 = vld [vmem:[#allocation5 + $0x790] sm:$0xff] }
  0xcb   :  { %5932 = vmatmul.mubr.msk.bf16.vlgmr.msra.gmra.mrb[68].mxu0 %vm2262_vm0, %v6131_v27  ;;  %5933 = vmatmul.mubr.msk.bf16.vlgmr.msra.gmra.mrb[68].mxu1 %vm2262_vm0, %v6131_v27  ;;  %v5720_v27 = vcombine.low %v93_v58, %v157_v59  ;;  %v100_v58 = vld [vmem:[#allocation5 + $0x170] sm:$0xff] }
  0xcc   :  { %3743 = vmatpush1.bf16.msra.mxu0 %v5714_v52  ;;  %3784 = vmatpush1.bf16.msra.mxu1 %v5716_v53  ;;  %v227_v52 = vld [vmem:[#allocation5 + $0x568] sm:$0xff]  ;;  %v164_v59 = vld [vmem:[#allocation5 + $0x370] sm:$0xff] }
  0xcd   :  { %3744 = vmatprep.subr.bf16.mxu0 %v5843_v54  ;;  %3785 = vmatprep.subr.bf16.mxu1 %v5845_v55  ;;  %v291_v53 = vld [vmem:[#allocation5 + $0x768] sm:$0xff]  ;;  %v5730_v54 = vcombine.low %v98_v42, %v162_v43  ;;  %v5732_v55 = vcombine.low %v99_v44, %v163_v45  ;;  %v5735_v1 = vcombine.high %v100_v58, %v164_v59  ;;  %v106_v44 = vld [vmem:[#allocation5 + $0x1a0] sm:$0xff] }
  0xce   :  { %3774 = vmatprep.mubr.bf16.mxu0 %v6070_v0  ;;  %3815 = vmatprep.mubr.bf16.mxu1 %v6070_v0  ;;  %v5861_v57 = vcombine.high %v227_v52, %v291_v53  ;;  %v5871_v42 = vcombine.high %v232_v36, %v296_v37  ;;  %v170_v45 = vld [vmem:[#allocation5 + $0x3a0] sm:$0xff] }
  0xd0   :  { %3745 = vmatpush1.bf16.msra.mxu0 %v5842_v60  ;;  %3786 = vmatpush1.bf16.msra.mxu1 %v5844_v61  ;;  %v101_v60 = vld [vmem:[#allocation5 + $0x178] sm:$0xff] }
  0xd1   :  { %3824 = vmatprep.subr.bf16.mxu0 %v5719_v62  ;;  %3865 = vmatprep.subr.bf16.mxu1 %v5721_v63  ;;  %v165_v61 = vld [vmem:[#allocation5 + $0x378] sm:$0xff]  ;;  %v5858_v62 = vcombine.low %v226_v50, %v290_v51  ;;  %v5860_v63 = vcombine.low %v227_v52, %v291_v53  ;;  %v5747_v50 = vcombine.high %v106_v44, %v170_v45  ;;  %v234_v52 = vld [vmem:[#allocation5 + $0x5a0] sm:$0xff] }
  0xd2   :  { %v5737_v2 = vcombine.high %v101_v60, %v165_v61  ;;  %v298_v53 = vld [vmem:[#allocation5 + $0x7a0] sm:$0xff] }
  0xd3   :  { %5934 = vmatmul.mubr.msk.bf16.vlgmr.msra.gmra.mrb[72].mxu0 %vm2262_vm0, %v6241_v10  ;;  %5935 = vmatmul.mubr.msk.bf16.vlgmr.msra.gmra.mrb[72].mxu1 %vm2262_vm0, %v6241_v10 }
  0xd4   :  { %3825 = vmatpush1.bf16.msra.mxu0 %v5718_v5  ;;  %3866 = vmatpush1.bf16.msra.mxu1 %v5720_v27  ;;  %v229_v5 = vld [vmem:[#allocation5 + $0x578] sm:$0xff] }
  0xd5   :  { %3826 = vmatprep.subr.bf16.mxu0 %v5847_v6  ;;  %3867 = vmatprep.subr.bf16.mxu1 %v5849_v7  ;;  %v293_v27 = vld [vmem:[#allocation5 + $0x778] sm:$0xff]  ;;  %v5734_v6 = vcombine.low %v100_v58, %v164_v59  ;;  %v5736_v7 = vcombine.low %v101_v60, %v165_v61  ;;  %v5875_v59 = vcombine.high %v234_v52, %v298_v53  ;;  %v108_v61 = vld [vmem:[#allocation5 + $0x1b0] sm:$0xff] }
  0xd6   :  { %3856 = vmatprep.mubr.bf16.mxu0 %v6070_v0  ;;  %3897 = vmatprep.mubr.bf16.mxu1 %v6070_v0  ;;  %v5865_v9 = vcombine.high %v229_v5, %v293_v27 }
  0xd8   :  { %3827 = vmatpush1.bf16.msra.mxu0 %v5846_v13  ;;  %3868 = vmatpush1.bf16.msra.mxu1 %v5848_v14  ;;  %v103_v13 = vld [vmem:[#allocation5 + $0x188] sm:$0xff] }
  0xd9   :  { %3906 = vmatprep.subr.bf16.mxu0 %v5723_v15  ;;  %3947 = vmatprep.subr.bf16.mxu1 %v5725_v16  ;;  %v167_v14 = vld [vmem:[#allocation5 + $0x388] sm:$0xff]  ;;  %v5862_v15 = vcombine.low %v228_v3, %v292_v4  ;;  %v5864_v16 = vcombine.low %v229_v5, %v293_v27  ;;  %v5874_v3 = vcombine.low %v234_v52, %v298_v53 }
  0xda   :  { %v5741_v18 = vcombine.high %v103_v13, %v167_v14 }
  0xdb   :  { %5936 = vmatmul.mubr.msk.bf16.vlgmr.msra.gmra.mrb[76].mxu0 %vm2262_vm0, %v6241_v10  ;;  %5937 = vmatmul.mubr.msk.bf16.vlgmr.msra.gmra.mrb[76].mxu1 %vm2262_vm0, %v6241_v10 }
  0xdc   :  { %3907 = vmatpush1.bf16.msra.mxu0 %v5722_v21  ;;  %3948 = vmatpush1.bf16.msra.mxu1 %v5724_v22  ;;  %v231_v21 = vld [vmem:[#allocation5 + $0x588] sm:$0xff] }
  0xdd   :  { %3908 = vmatprep.subr.bf16.mxu0 %v5851_v23  ;;  %3949 = vmatprep.subr.bf16.mxu1 %v5853_v24  ;;  %v295_v22 = vld [vmem:[#allocation5 + $0x788] sm:$0xff]  ;;  %v5738_v23 = vcombine.low %v102_v11, %v166_v12  ;;  %v5740_v24 = vcombine.low %v103_v13, %v167_v14  ;;  %v237_v12 = vld [vmem:[#allocation5 + $0x5b8] sm:$0xff] }
  0xde   :  { %3938 = vmatprep.mubr.bf16.mxu0 %v6070_v0  ;;  %3979 = vmatprep.mubr.bf16.mxu1 %v6070_v0  ;;  %v5869_v26 = vcombine.high %v231_v21, %v295_v22  ;;  %v301_v13 = vld [vmem:[#allocation5 + $0x7b8] sm:$0xff] }
  0xe0   :  { %3909 = vmatpush1.bf16.msra.mxu0 %v5850_v30  ;;  %3950 = vmatpush1.bf16.msra.mxu1 %v5852_v31  ;;  %v105_v30 = vld [vmem:[#allocation5 + $0x198] sm:$0xff] }
  0xe1   :  { %3988 = vmatprep.subr.bf16.mxu0 %v5727_v32  ;;  %4029 = vmatprep.subr.bf16.mxu1 %v5729_v33  ;;  %v169_v31 = vld [vmem:[#allocation5 + $0x398] sm:$0xff]  ;;  %v5866_v32 = vcombine.low %v230_v19, %v294_v20  ;;  %v5868_v33 = vcombine.low %v231_v21, %v295_v22  ;;  %v5881_v21 = vcombine.high %v237_v12, %v301_v13  ;;  %v110_v22 = vld [vmem:[#allocation5 + $0x1c0] sm:$0xff] }
  0xe2   :  { %v5745_v35 = vcombine.high %v105_v30, %v169_v31 }
  0xe3   :  { %5938 = vmatmul.mubr.msk.bf16.vlgmr.msra.gmra.mrb[80].mxu0 %vm2262_vm0, %v6241_v10  ;;  %5939 = vmatmul.mubr.msk.bf16.vlgmr.msra.gmra.mrb[80].mxu1 %vm2262_vm0, %v6241_v10 }
  0xe4   :  { %3989 = vmatpush1.bf16.msra.mxu0 %v5726_v38  ;;  %4030 = vmatpush1.bf16.msra.mxu1 %v5728_v39  ;;  %v233_v38 = vld [vmem:[#allocation5 + $0x598] sm:$0xff] }
  0xe5   :  { %3990 = vmatprep.subr.bf16.mxu0 %v5855_v40  ;;  %4031 = vmatprep.subr.bf16.mxu1 %v5857_v41  ;;  %v297_v39 = vld [vmem:[#allocation5 + $0x798] sm:$0xff]  ;;  %v5742_v40 = vcombine.low %v104_v28, %v168_v29  ;;  %v5744_v41 = vcombine.low %v105_v30, %v169_v31  ;;  %v175_v28 = vld [vmem:[#allocation5 + $0x3c8] sm:$0xff] }
  0xe6   :  { %4020 = vmatprep.mubr.bf16.mxu0 %v6070_v0  ;;  %4061 = vmatprep.mubr.bf16.mxu1 %v6070_v0  ;;  %v5873_v43 = vcombine.high %v233_v38, %v297_v39 }
  0xe8   :  { %3991 = vmatpush1.bf16.msra.mxu0 %v5854_v46  ;;  %4032 = vmatpush1.bf16.msra.mxu1 %v5856_v47  ;;  %v107_v46 = vld [vmem:[#allocation5 + $0x1a8] sm:$0xff] }
  0xe9   :  { %4070 = vmatprep.subr.bf16.mxu0 %v5731_v48  ;;  %4111 = vmatprep.subr.bf16.mxu1 %v5733_v49  ;;  %v171_v47 = vld [vmem:[#allocation5 + $0x3a8] sm:$0xff]  ;;  %v5870_v48 = vcombine.low %v232_v36, %v296_v37  ;;  %v5872_v49 = vcombine.low %v233_v38, %v297_v39  ;;  %v6323_v38 = vld [vmem:[#allocation5 + $0x5c0] sm:$0xff] }
  0xea   :  { %v5749_v51 = vcombine.high %v107_v46, %v171_v47  ;;  %v5748_v58 = vcombine.low %v107_v46, %v171_v47  ;;  %v6325_v39 = vld [vmem:[#allocation5 + $0x7c0] sm:$0xff]  ;;  %v239_v46 = vld [vmem:[#allocation5 + $0x5c8] sm:$0xff] }
  0xeb   :  { %5940 = vmatmul.mubr.msk.bf16.vlgmr.msra.gmra.mrb[84].mxu0 %vm2262_vm0, %v6241_v10  ;;  %5941 = vmatmul.mubr.msk.bf16.vlgmr.msra.gmra.mrb[84].mxu1 %vm2262_vm0, %v6241_v10  ;;  %v303_v47 = vld [vmem:[#allocation5 + $0x7c8] sm:$0xff] }
  0xec   :  { %4071 = vmatpush1.bf16.msra.mxu0 %v5730_v54  ;;  %4112 = vmatpush1.bf16.msra.mxu1 %v5732_v55  ;;  %v235_v54 = vld [vmem:[#allocation5 + $0x5a8] sm:$0xff] }
  0xed   :  { %4072 = vmatprep.subr.bf16.mxu0 %v5859_v56  ;;  %4113 = vmatprep.subr.bf16.mxu1 %v5861_v57  ;;  %v299_v55 = vld [vmem:[#allocation5 + $0x7a8] sm:$0xff]  ;;  %v342_v56 = vlaneseq  ;;  %v5746_v57 = vcombine.low %v106_v44, %v170_v45 }
  0xee   :  { %4102 = vmatprep.mubr.bf16.mxu0 %v6070_v0  ;;  %4143 = vmatprep.mubr.bf16.mxu1 %v6070_v0  ;;  %v5877_v60 = vcombine.high %v235_v54, %v299_v55  ;;  %v5876_v4 = vcombine.low %v235_v54, %v299_v55 }
  0xf0   :  { %4073 = vmatpush1.bf16.msra.mxu0 %v5858_v62  ;;  %4114 = vmatpush1.bf16.msra.mxu1 %v5860_v63  ;;  %v172_v62 = vld [vmem:[#allocation5 + $0x3b0] sm:$0xff]  ;;  %v109_v63 = vld [vmem:[#allocation5 + $0x1b8] sm:$0xff] }
  0xf1   :  { %4152 = vmatprep.subr.bf16.mxu0 %v5735_v1  ;;  %4193 = vmatprep.subr.bf16.mxu1 %v5737_v2  ;;  %v173_v1 = vld [vmem:[#allocation5 + $0x3b8] sm:$0xff]  ;;  %v6287_v2 = vshrl.u32 %v342_v56, 7  ;;  %v5751_v5 = vcombine.high %v108_v61, %v172_v62  ;;  %v5750_v14 = vcombine.low %v108_v61, %v172_v62  ;;  %v5885_v61 = vcombine.high %v239_v46, %v303_v47  ;;  %v112_v62 = vld [vmem:[#allocation5 + $0x1d0] sm:$0xff] }
  0xf2   :  { %v5753_v27 = vcombine.high %v109_v63, %v173_v1 }
  0xf3   :  { %5942 = vmatmul.mubr.msk.bf16.vlgmr.msra.gmra.mrb[88].mxu0 %vm2262_vm0, %v6241_v10  ;;  %5943 = vmatmul.mubr.msk.bf16.vlgmr.msra.gmra.mrb[88].mxu1 %vm2262_vm0, %v6241_v10  ;;  %v6305_v19 = vsub.s32 3, %v6287_v2  ;;  %v6321_v37 = vsub.s32 4, %v6287_v2  ;;  %v6332_v44 = vsub.s32 6, %v6287_v2  ;;  %v6335_v45 = vsub.s32 5, %v6287_v2 }
  0xf4   :  { %4153 = vmatpush1.bf16.msra.mxu0 %v5734_v6  ;;  %4194 = vmatpush1.bf16.msra.mxu1 %v5736_v7  ;;  %v236_v6 = vld [vmem:[#allocation5 + $0x5b0] sm:$0xff]  ;;  %v6338_v53 = vsub.s32 7, %v6287_v2 }
  0xf5   :  { %4154 = vmatprep.subr.bf16.mxu0 %v5863_v8  ;;  %4195 = vmatprep.subr.bf16.mxu1 %v5865_v9  ;;  %v300_v7 = vld [vmem:[#allocation5 + $0x7b0] sm:$0xff]  ;;  %v6294_v8 = vsub.s32 0, %v6287_v2  ;;  %v6071_v9 = vmov 1983009808  }
  0xf6   :  { %4184 = vmatprep.mubr.bf16.mxu0 %v6070_v0  ;;  %4225 = vmatprep.mubr.bf16.mxu1 %v6070_v0  ;;  %v5021_v11 = vunpack.c.l.s4 %v6071_v9  ;;  %v5879_v20 = vcombine.high %v236_v6, %v300_v7  ;;  %v5878_v31 = vcombine.low %v236_v6, %v300_v7  ;;  %v5882_v9 = vcombine.low %v6323_v38, %v6325_v39 }
  0xf8   :  { %4155 = vmatpush1.bf16.msra.mxu0 %v5862_v15  ;;  %4196 = vmatpush1.bf16.msra.mxu1 %v5864_v16  ;;  %v6296_v15 = vld [vmem:[#allocation7] sm:$0xff]  ;;  %v6299_v16 = vsub.s32 2, %v6287_v2 }
  0xf9   :  { %4234 = vmatprep.subr.bf16.mxu0 %v5739_v17  ;;  %4275 = vmatprep.subr.bf16.mxu1 %v5741_v18  ;;  %v6302_v17 = vsub.s32 1, %v6287_v2  ;;  %v5752_v18 = vcombine.low %v109_v63, %v173_v1  ;;  %v176_v63 = vld [vmem:[#allocation5 + $0x3d0] sm:$0xff]  ;;  %v373_v7 = vrot.slane %v6296_v15, %v6338_v53 }
  0xfa   :  { %v353_v29 = vrot.slane %v6296_v15, %v6299_v16 }
  0xfb   :  { %5944 = vmatmul.mubr.msk.bf16.vlgmr.msra.gmra.mrb[92].mxu0 %vm2262_vm0, %v6241_v10  ;;  %5945 = vmatmul.mubr.msk.bf16.vlgmr.msra.gmra.mrb[92].mxu1 %vm2262_vm0, %v6241_v10  ;;  %v349_v30 = vrot.slane %v6296_v15, %v6302_v17 }
  0xfc   :  { %4235 = vmatpush1.bf16.msra.mxu0 %v5738_v23  ;;  %4276 = vmatpush1.bf16.msra.mxu1 %v5740_v24  ;;  %v174_v23 = vld [vmem:[#allocation5 + $0x3c0] sm:$0xff]  ;;  %v345_v24 = vrot.slane %v6296_v15, %v6294_v8 }
  0xfd   :  { %4236 = vmatprep.subr.bf16.mxu0 %v5867_v25  ;;  %4277 = vmatprep.subr.bf16.mxu1 %v5869_v26  ;;  %v5022_v25 = vunpack.c.0.s8 %v5021_v11  ;;  %v111_v26 = vld [vmem:[#allocation5 + $0x1c8] sm:$0xff]  ;;  %v5754_v52 = vcombine.low %v110_v22, %v174_v23 }
  0xfe   :  { %4266 = vmatprep.mubr.bf16.mxu0 %v6070_v0  ;;  %4307 = vmatprep.mubr.bf16.mxu1 %v6070_v0  ;;  %v5757_v36 = vcombine.high %v111_v26, %v175_v28 }
 0x100   :  { %4237 = vmatpush1.bf16.msra.mxu0 %v5866_v32  ;;  %4278 = vmatpush1.bf16.msra.mxu1 %v5868_v33  ;;  %v357_v32 = vrot.slane %v6296_v15, %v6305_v19  ;;  %v5880_v33 = vcombine.low %v237_v12, %v301_v13  ;;  %v5884_v12 = vcombine.low %v239_v46, %v303_v47  ;;  %v114_v46 = vld [vmem:[#allocation5 + $0x1e0] sm:$0xff] }
 0x101   :  { %4316 = vmatprep.subr.bf16.mxu0 %v5743_v34  ;;  %4357 = vmatprep.subr.bf16.mxu1 %v5745_v35  ;;  %v5755_v34 = vcombine.high %v110_v22, %v174_v23  ;;  %v5759_v13 = vcombine.high %v112_v62, %v176_v63  ;;  %v178_v47 = vld [vmem:[#allocation5 + $0x3e0] sm:$0xff] }
 0x103   :  { %5946 = vmatmul.mubr.msk.bf16.vlgmr.msra.gmra.mrb[96].mxu0 %vm2262_vm0, %v6241_v10  ;;  %5947 = vmatmul.mubr.msk.bf16.vlgmr.msra.gmra.mrb[96].mxu1 %vm2262_vm0, %v6241_v10 }
 0x104   :  { %4317 = vmatpush1.bf16.msra.mxu0 %v5742_v40  ;;  %4358 = vmatpush1.bf16.msra.mxu1 %v5744_v41 }
 0x105   :  { %4318 = vmatprep.subr.bf16.mxu0 %v5871_v42  ;;  %4359 = vmatprep.subr.bf16.mxu1 %v5873_v43  ;;  %v6328_v43 = vsub.s32 %v5022_v25, %v6287_v2  ;;  %v361_v2 = vrot.slane %v6296_v15, %v6321_v37  ;;  %v241_v25 = vld [vmem:[#allocation5 + $0x5d8] sm:$0xff] }
 0x106   :  { %4348 = vmatprep.mubr.bf16.mxu0 %v6070_v0  ;;  %4389 = vmatprep.mubr.bf16.mxu1 %v6070_v0 }
 0x108   :  { %4319 = vmatpush1.bf16.msra.mxu0 %v5870_v48  ;;  %4360 = vmatpush1.bf16.msra.mxu1 %v5872_v49 }
 0x109   :  { %4398 = vmatprep.subr.bf16.mxu0 %v5747_v50  ;;  %4439 = vmatprep.subr.bf16.mxu1 %v5749_v51 }
 0x10b   :  { %5948 = vmatmul.mubr.msk.bf16.vlgmr.msra.gmra.mrb[100].mxu0 %vm2262_vm0, %v6241_v10  ;;  %5949 = vmatmul.mubr.msk.bf16.vlgmr.msra.gmra.mrb[100].mxu1 %vm2262_vm0, %v6241_v10 }
 0x10c   :  { %4399 = vmatpush1.bf16.msra.mxu0 %v5746_v57  ;;  %4440 = vmatpush1.bf16.msra.mxu1 %v5748_v58  ;;  %v5756_v57 = vcombine.low %v111_v26, %v175_v28  ;;  %v5883_v58 = vcombine.high %v6323_v38, %v6325_v39  ;;  %v305_v26 = vld [vmem:[#allocation5 + $0x7d8] sm:$0xff] }
 0x10d   :  { %4400 = vmatprep.subr.bf16.mxu0 %v5875_v59  ;;  %4441 = vmatprep.subr.bf16.mxu1 %v5877_v60 }
 0x10e   :  { %4430 = vmatprep.mubr.bf16.mxu0 %v6070_v0  ;;  %4471 = vmatprep.mubr.bf16.mxu1 %v6070_v0 }
 0x110   :  { %4401 = vmatpush1.bf16.msra.mxu0 %v5874_v3  ;;  %4442 = vmatpush1.bf16.msra.mxu1 %v5876_v4  ;;  %v369_v3 = vrot.slane %v6296_v15, %v6332_v44  ;;  %v365_v4 = vrot.slane %v6296_v15, %v6335_v45 }
 0x111   :  { %4480 = vmatprep.subr.bf16.mxu0 %v5751_v5  ;;  %4521 = vmatprep.subr.bf16.mxu1 %v5753_v27  ;;  %v113_v5 = vld [vmem:[#allocation5 + $0x1d8] sm:$0xff] }
 0x112   :  { %v177_v27 = vld [vmem:[#allocation5 + $0x3d8] sm:$0xff] }
 0x113   :  { %5950 = vmatmul.mubr.msk.bf16.vlgmr.msra.gmra.mrb[104].mxu0 %vm2262_vm0, %v6241_v10  ;;  %5951 = vmatmul.mubr.msk.bf16.vlgmr.msra.gmra.mrb[104].mxu1 %vm2262_vm0, %v6241_v10  ;;  %v5760_v38 = vcombine.low %v113_v5, %v177_v27 }
 0x114   :  { %4481 = vmatpush1.bf16.msra.mxu0 %v5750_v14  ;;  %4522 = vmatpush1.bf16.msra.mxu1 %v5752_v18  ;;  %v5761_v18 = vcombine.high %v113_v5, %v177_v27  ;;  %v243_v27 = vld [vmem:[#allocation5 + $0x5e8] sm:$0xff] }
 0x115   :  { %4482 = vmatprep.subr.bf16.mxu0 %v5879_v20  ;;  %4523 = vmatprep.subr.bf16.mxu1 %v5881_v21  ;;  %v6359_v20 = vld [vmem:[#allocation5 + $0x5d0] sm:$0xff] }
 0x116   :  { %v2300_v35 = vpop.f32.mrb[0].mxu0  ;;  %4512 = vmatprep.mubr.bf16.mxu0 %v6070_v0  ;;  %v2341_v41 = vpop.f32.mrb[0].mxu1  ;;  %4553 = vmatprep.mubr.bf16.mxu1 %v6070_v0  ;;  %v6361_v21 = vld [vmem:[#allocation5 + $0x7d0] sm:$0xff] }
 0x117   :  { %v2301_v40 = vadd.f32 %v2300_v35, %v345_v24  ;;  %v2302_v42 = vpop.f32.mrb[1].mxu0  ;;  %v2342_v48 = vadd.f32 %v2341_v41, %v353_v29  ;;  %v2343_v50 = vpop.f32.mrb[1].mxu1  ;;  %v5887_v39 = vcombine.high %v6359_v20, %v6361_v21 }
 0x118   :  { %v2303_v49 = vadd.f32 %v2302_v42, %v349_v30  ;;  %v2304_v51 = vpop.f32.mrb[2].mxu0  ;;  %4483 = vmatpush1.bf16.msra.mxu0 %v5878_v31  ;;  %v2344_v54 = vadd.f32 %v2343_v50, %v357_v32  ;;  %v2345_v55 = vpop.f32.mrb[2].mxu1  ;;  %4524 = vmatpush1.bf16.msra.mxu1 %v5880_v33  ;;  %v5758_v32 = vcombine.low %v112_v62, %v176_v63  ;;  %v6364_v33 = vld [vmem:[#allocation7 + $0x8] sm:$0xff]  ;;  %v6385_v63 = vld [vmem:[#allocation5 + $0x5e0] sm:$0xff] }
 0x119   :  { %v2305_v56 = vpop.f32.mrb[3].mxu0  ;;  %4562 = vmatprep.subr.bf16.mxu0 %v5755_v34  ;;  %v2346_v60 = vpop.f32.mrb[3].mxu1  ;;  %4603 = vmatprep.subr.bf16.mxu1 %v5757_v36  ;;  %v5889_v42 = vcombine.high %v241_v25, %v305_v26  ;;  %v385_v50 = vrot.slane %v6364_v33, %v6299_v16  ;;  %v381_v51 = vrot.slane %v6364_v33, %v6302_v17 }
 0x11a   :  { %v5018_v59 = vcombine.low %v2301_v40, %v2303_v49  ;;  %v5019_v1 = vcombine.low %v2342_v48, %v2344_v54  ;;  %v377_v49 = vrot.slane %v6364_v33, %v6294_v8  ;;  %v179_v54 = vld [vmem:[#allocation5 + $0x3e8] sm:$0xff]  ;;  %v389_v56 = vrot.slane %v6364_v33, %v6305_v19 }
 0x11b   :  { %5952 = vmatmul.mubr.msk.bf16.vlgmr.msra.gmra.mrb[108].mxu0 %vm2262_vm0, %v6241_v10  ;;  %5953 = vmatmul.mubr.msk.bf16.vlgmr.msra.gmra.mrb[108].mxu1 %vm2262_vm0, %v6241_v10  ;;  %v5763_v60 = vcombine.high %v114_v46, %v178_v47 }
 0x11c   :  { %v5026_v6 = vrot.slane %v5018_v59, %v6328_v43  ;;  %4563 = vmatpush1.bf16.msra.mxu0 %v5754_v52  ;;  %v5033_v11 = vrot.slane %v5019_v1, %v6328_v43  ;;  %4604 = vmatpush1.bf16.msra.mxu1 %v5756_v57  ;;  %v115_v52 = vld [vmem:[#allocation5 + $0x1e8] sm:$0xff]  ;;  %v5886_v57 = vcombine.low %v6359_v20, %v6361_v21  ;;  %v306_v1 = vld [vmem:[#allocation5 + $0x7e0] sm:$0xff] }
 0x11d   :  { %4564 = vmatprep.subr.bf16.mxu0 %v5883_v58  ;;  %4605 = vmatprep.subr.bf16.mxu1 %v5885_v61  ;;  %v5888_v59 = vcombine.low %v241_v25, %v305_v26  ;;  %v5765_v62 = vcombine.high %v115_v52, %v179_v54  ;;  %v5764_v21 = vcombine.low %v115_v52, %v179_v54  ;;  %v116_v25 = vld [vmem:[#allocation5 + $0x1f0] sm:$0xff]  ;;  %v309_v54 = vld [vmem:[#allocation5 + $0x7f8] sm:$0xff] }
 0x11e   :  { %v2382_v14 = vpop.f32.mrb[4].mxu0  ;;  %4594 = vmatprep.mubr.bf16.mxu0 %v6070_v0  ;;  %v5034_v22 = vcombine.low %v5026_v6, %v5033_v11  ;;  %v2423_v23 = vpop.f32.mrb[4].mxu1  ;;  %4635 = vmatprep.mubr.bf16.mxu1 %v6070_v0  ;;  %v307_v6 = vld [vmem:[#allocation5 + $0x7e8] sm:$0xff]  ;;  %v180_v26 = vld [vmem:[#allocation5 + $0x3f0] sm:$0xff] }
 0x11f   :  { %v2383_v15 = vadd.f32 %v2382_v14, %v361_v2  ;;  %v2384_v24 = vpop.f32.mrb[5].mxu0  ;;  %v2424_v28 = vadd.f32 %v2423_v23, %v369_v3  ;;  %v2425_v30 = vpop.f32.mrb[5].mxu1 }
 0x120   :  { %v2385_v29 = vadd.f32 %v2384_v24, %v365_v4  ;;  %v2386_v31 = vpop.f32.mrb[6].mxu0  ;;  %4565 = vmatpush1.bf16.msra.mxu0 %v5882_v9  ;;  %5594 = vst [vmem:[#allocation8] sm:$0xff] %v5034_v22  ;;  %v2426_v34 = vadd.f32 %v2425_v30, %v373_v7  ;;  %v2427_v35 = vpop.f32.mrb[6].mxu1  ;;  %4606 = vmatpush1.bf16.msra.mxu1 %v5884_v12 }
 0x121   :  { %v2387_v36 = vpop.f32.mrb[7].mxu0  ;;  %4644 = vmatprep.subr.bf16.mxu0 %v5759_v13  ;;  %v2428_v41 = vpop.f32.mrb[7].mxu1  ;;  %4685 = vmatprep.subr.bf16.mxu1 %v5761_v18  ;;  %v5762_v13 = vcombine.low %v114_v46, %v178_v47  ;;  %v5891_v22 = vcombine.high %v6385_v63, %v306_v1  ;;  %v5893_v24 = vcombine.high %v243_v27, %v307_v6  ;;  %v244_v47 = vld [vmem:[#allocation5 + $0x5f0] sm:$0xff] }
 0x122   :  { %v5035_v40 = vcombine.low %v2383_v15, %v2385_v29  ;;  %v5036_v48 = vcombine.low %v2424_v28, %v2426_v34  ;;  %v393_v29 = vrot.slane %v6364_v33, %v6321_v37  ;;  %v401_v30 = vrot.slane %v6364_v33, %v6332_v44  ;;  %v181_v34 = vld [vmem:[#allocation5 + $0x3f8] sm:$0xff] }
 0x123   :  { %5954 = vmatmul.mubr.msk.bf16.vlgmr.msra.gmra.mrb[112].mxu0 %vm2262_vm0, %v6241_v10  ;;  %5955 = vmatmul.mubr.msk.bf16.vlgmr.msra.gmra.mrb[112].mxu1 %vm2262_vm0, %v6241_v10  ;;  %v397_v31 = vrot.slane %v6364_v33, %v6335_v45  ;;  %v405_v36 = vrot.slane %v6364_v33, %v6338_v53  ;;  %v5767_v41 = vcombine.high %v116_v25, %v180_v26  ;;  %v245_v33 = vld [vmem:[#allocation5 + $0x5f8] sm:$0xff] }
 0x124   :  { %v5043_v55 = vrot.slane %v5035_v40, %v6328_v43  ;;  %4645 = vmatpush1.bf16.msra.mxu0 %v5758_v32  ;;  %v5050_v58 = vrot.slane %v5036_v48, %v6328_v43  ;;  %4686 = vmatpush1.bf16.msra.mxu1 %v5760_v38  ;;  %v117_v32 = vld [vmem:[#allocation5 + $0x1f8] sm:$0xff]  ;;  %v5890_v38 = vcombine.low %v6385_v63, %v306_v1  ;;  %v308_v48 = vld [vmem:[#allocation5 + $0x7f0] sm:$0xff] }
 0x125   :  { %4646 = vmatprep.subr.bf16.mxu0 %v5887_v39  ;;  %4687 = vmatprep.subr.bf16.mxu1 %v5889_v42  ;;  %v5892_v40 = vcombine.low %v243_v27, %v307_v6  ;;  %v5769_v46 = vcombine.high %v117_v32, %v181_v34  ;;  %v5768_v1 = vcombine.low %v117_v32, %v181_v34 }
 0x126   :  { %v2464_v61 = vpop.f32.mrb[8].mxu0  ;;  %4676 = vmatprep.mubr.bf16.mxu0 %v6070_v0  ;;  %v5051_v2 = vcombine.low %v5043_v55, %v5050_v58  ;;  %v2505_v4 = vpop.f32.mrb[8].mxu1  ;;  %4717 = vmatprep.mubr.bf16.mxu1 %v6070_v0 }
 0x127   :  { %v2465_v3 = vadd.f32 %v2464_v61, %v377_v49  ;;  %v2466_v5 = vpop.f32.mrb[9].mxu0  ;;  %v2506_v7 = vadd.f32 %v2505_v4, %v385_v50  ;;  %v2507_v11 = vpop.f32.mrb[9].mxu1 }
 0x128   :  { %v2467_v9 = vadd.f32 %v2466_v5, %v381_v51  ;;  %v2468_v12 = vpop.f32.mrb[10].mxu0  ;;  %4647 = vmatpush1.bf16.msra.mxu0 %v5886_v57  ;;  %5595 = vst [vmem:[#allocation8 + $0x8] sm:$0xff] %v5051_v2  ;;  %v2508_v14 = vadd.f32 %v2507_v11, %v389_v56  ;;  %v2509_v18 = vpop.f32.mrb[10].mxu1  ;;  %4688 = vmatpush1.bf16.msra.mxu1 %v5888_v59 }
 0x129   :  { %v2469_v20 = vpop.f32.mrb[11].mxu0  ;;  %4726 = vmatprep.subr.bf16.mxu0 %v5763_v60  ;;  %v2510_v23 = vpop.f32.mrb[11].mxu1  ;;  %4767 = vmatprep.subr.bf16.mxu1 %v5765_v62  ;;  %v5766_v59 = vcombine.low %v116_v25, %v180_v26  ;;  %v6406_v60 = vld [vmem:[#allocation7 + $0x10] sm:$0xff]  ;;  %v5895_v2 = vcombine.high %v244_v47, %v308_v48  ;;  %v5897_v5 = vcombine.high %v245_v33, %v309_v54 }
 0x12a   :  { %v5052_v15 = vcombine.low %v2465_v3, %v2467_v9  ;;  %v5053_v28 = vcombine.low %v2506_v7, %v2508_v14  ;;  %v409_v6 = vrot.slane %v6406_v60, %v6294_v8  ;;  %v417_v7 = vrot.slane %v6406_v60, %v6299_v16 }
 0x12b   :  { %5956 = vmatmul.mubr.msk.bf16.vlgmr.msra.gmra.mrb[116].mxu0 %vm2262_vm0, %v6241_v10  ;;  %5957 = vmatmul.mubr.msk.bf16.vlgmr.msra.gmra.mrb[116].mxu1 %vm2262_vm0, %v6241_v10  ;;  %v413_v11 = vrot.slane %v6406_v60, %v6302_v17  ;;  %v5894_v12 = vcombine.low %v244_v47, %v308_v48  ;;  %v421_v14 = vrot.slane %v6406_v60, %v6305_v19 }
 0x12c   :  { %v5060_v35 = vrot.slane %v5052_v15, %v6328_v43  ;;  %4727 = vmatpush1.bf16.msra.mxu0 %v5762_v13  ;;  %v5067_v39 = vrot.slane %v5053_v28, %v6328_v43  ;;  %4768 = vmatpush1.bf16.msra.mxu1 %v5764_v21  ;;  %v5896_v18 = vcombine.low %v245_v33, %v309_v54  ;;  %v313_v33 = vld [vmem:[#allocation7 + $0x18] sm:$0xff] }
 0x12d   :  { %4728 = vmatprep.subr.bf16.mxu0 %v5891_v22  ;;  %4769 = vmatprep.subr.bf16.mxu1 %v5893_v24 }
 0x12e   :  { %v2546_v42 = vpop.f32.mrb[12].mxu0  ;;  %4758 = vmatprep.mubr.bf16.mxu0 %v6070_v0  ;;  %v5068_v49 = vcombine.low %v5060_v35, %v5067_v39  ;;  %v2587_v51 = vpop.f32.mrb[12].mxu1  ;;  %4799 = vmatprep.mubr.bf16.mxu1 %v6070_v0  ;;  %v429_v39 = vrot.slane %v6406_v60, %v6335_v45 }
 0x12f   :  { %v2547_v50 = vadd.f32 %v2546_v42, %v393_v29  ;;  %v2548_v52 = vpop.f32.mrb[13].mxu0  ;;  %v2588_v55 = vadd.f32 %v2587_v51, %v401_v30  ;;  %v2589_v57 = vpop.f32.mrb[13].mxu1 }
 0x130   :  { %v2549_v56 = vadd.f32 %v2548_v52, %v397_v31  ;;  %v2550_v58 = vpop.f32.mrb[14].mxu0  ;;  %4729 = vmatpush1.bf16.msra.mxu0 %v5890_v38  ;;  %5596 = vst [vmem:[#allocation8 + $0x10] sm:$0xff] %v5068_v49  ;;  %v2590_v61 = vadd.f32 %v2589_v57, %v405_v36  ;;  %v2591_v62 = vpop.f32.mrb[14].mxu1  ;;  %4770 = vmatpush1.bf16.msra.mxu1 %v5892_v40 }
 0x131   :  { %v2551_v63 = vpop.f32.mrb[15].mxu0  ;;  %4808 = vmatprep.subr.bf16.mxu0 %v5767_v41  ;;  %v2592_v4 = vpop.f32.mrb[15].mxu1  ;;  %4849 = vmatprep.subr.bf16.mxu1 %v5769_v46  ;;  %v425_v36 = vrot.slane %v6406_v60, %v6321_v37  ;;  %v433_v38 = vrot.slane %v6406_v60, %v6332_v44  ;;  %v437_v41 = vrot.slane %v6406_v60, %v6338_v53 }
 0x132   :  { %v5069_v3 = vcombine.low %v2547_v50, %v2549_v56  ;;  %v5070_v27 = vcombine.low %v2588_v55, %v2590_v61  ;;  %v441_v61 = vrot.slane %v313_v33, %v6294_v8  ;;  %v449_v62 = vrot.slane %v313_v33, %v6299_v16 }
 0x133   :  { %5958 = vmatmul.mubr.msk.bf16.vlgmr.msra.gmra.mrb[120].mxu0 %vm2262_vm0, %v6241_v10  ;;  %5959 = vmatmul.mubr.msk.bf16.vlgmr.msra.gmra.mrb[120].mxu1 %vm2262_vm0, %v6241_v10  ;;  %v445_v63 = vrot.slane %v313_v33, %v6302_v17 }
 0x134   :  { %v5077_v9 = vrot.slane %v5069_v3, %v6328_v43  ;;  %4809 = vmatpush1.bf16.msra.mxu0 %v5766_v59  ;;  %v5084_v13 = vrot.slane %v5070_v27, %v6328_v43  ;;  %4850 = vmatpush1.bf16.msra.mxu1 %v5768_v1 }
 0x135   :  { %4810 = vmatprep.subr.bf16.mxu0 %v5895_v2  ;;  %4851 = vmatprep.subr.bf16.mxu1 %v5897_v5  ;;  %v453_v2 = vrot.slane %v313_v33, %v6305_v19 }
 0x136   :  { %v2628_v20 = vpop.f32.mrb[16].mxu0  ;;  %4840 = vmatprep.mubr.bf16.mxu0 %v6070_v0  ;;  %v5085_v21 = vcombine.low %v5077_v9, %v5084_v13  ;;  %v2669_v15 = vpop.f32.mrb[16].mxu1  ;;  %4881 = vmatprep.mubr.bf16.mxu1 %v6070_v0 }
 0x137   :  { %v2629_v22 = vadd.f32 %v2628_v20, %v409_v6  ;;  %v2630_v23 = vpop.f32.mrb[17].mxu0  ;;  %v2670_v24 = vadd.f32 %v2669_v15, %v417_v7  ;;  %v2671_v26 = vpop.f32.mrb[17].mxu1  ;;  %v457_v15 = vrot.slane %v313_v33, %v6321_v37 }
 0x138   :  { %v2631_v25 = vadd.f32 %v2630_v23, %v413_v11  ;;  %v2632_v28 = vpop.f32.mrb[18].mxu0  ;;  %4811 = vmatpush1.bf16.msra.mxu0 %v5894_v12  ;;  %5597 = vst [vmem:[#allocation8 + $0x18] sm:$0xff] %v5085_v21  ;;  %v2672_v29 = vadd.f32 %v2671_v26, %v421_v14  ;;  %v2673_v30 = vpop.f32.mrb[18].mxu1  ;;  %4852 = vmatpush1.bf16.msra.mxu1 %v5896_v18 }
 0x139   :  { %v2633_v31 = vpop.f32.mrb[19].mxu0  ;;  %v2674_v34 = vpop.f32.mrb[19].mxu1  ;;  %v469_v28 = vrot.slane %v313_v33, %v6338_v53 }
 0x13a   :  { %v5086_v32 = vcombine.low %v2629_v22, %v2631_v25  ;;  %v5087_v35 = vcombine.low %v2670_v24, %v2672_v29  ;;  %v465_v24 = vrot.slane %v313_v33, %v6332_v44  ;;  %v461_v25 = vrot.slane %v313_v33, %v6335_v45 }
 0x13b   :  { %5960 = vmatmul.mubr.msk.bf16.vlgmr.msra.gmra.mrb[124].mxu0 %vm2262_vm0, %v6241_v10  ;;  %5961 = vmatmul.mubr.msk.bf16.vlgmr.msra.gmra.mrb[124].mxu1 %vm2262_vm0, %v6241_v10 }
 0x13c   :  { %v5094_v0 = vrot.slane %v5086_v32, %v6328_v43  ;;  %v5101_v40 = vrot.slane %v5087_v35, %v6328_v43 }
 0x13e   :  { %v2710_v42 = vpop.f32.mrb[20].mxu0  ;;  %v5102_v46 = vcombine.low %v5094_v0, %v5101_v40  ;;  %v2751_v48 = vpop.f32.mrb[20].mxu1 }
 0x13f   :  { %v2711_v47 = vadd.f32 %v2710_v42, %v425_v36  ;;  %v2712_v49 = vpop.f32.mrb[21].mxu0  ;;  %v2752_v50 = vadd.f32 %v2751_v48, %v433_v38  ;;  %v2753_v52 = vpop.f32.mrb[21].mxu1 }
 0x140   :  { %v2713_v51 = vadd.f32 %v2712_v49, %v429_v39  ;;  %v2714_v10 = vpop.f32.mrb[22].mxu0  ;;  %5598 = vst [vmem:[#allocation8 + $0x20] sm:$0xff] %v5102_v46  ;;  %v2754_v54 = vadd.f32 %v2753_v52, %v437_v41  ;;  %v2755_v55 = vpop.f32.mrb[22].mxu1  ;;  %v314_v39 = vld [vmem:[#allocation7 + $0x20] sm:$0xff] }
 0x141   :  { %v2715_v56 = vpop.f32.mrb[23].mxu0  ;;  %v2756_v58 = vpop.f32.mrb[23].mxu1  ;;  %v473_v49 = vrot.slane %v314_v39, %v6294_v8  ;;  %v477_v52 = vrot.slane %v314_v39, %v6302_v17  ;;  %v485_v33 = vrot.slane %v314_v39, %v6305_v19 }
 0x142   :  { %v5103_v57 = vcombine.low %v2711_v47, %v2713_v51  ;;  %v5104_v59 = vcombine.low %v2752_v50, %v2754_v54  ;;  %v481_v51 = vrot.slane %v314_v39, %v6299_v16 }
 0x144   :  { %v5111_v60 = vrot.slane %v5103_v57, %v6328_v43  ;;  %v5118_v1 = vrot.slane %v5104_v59, %v6328_v43 }
 0x146   :  { %v2792_v3 = vpop.f32.mrb[24].mxu0  ;;  %v5119_v4 = vcombine.low %v5111_v60, %v5118_v1  ;;  %v2833_v27 = vpop.f32.mrb[24].mxu1 }
 0x147   :  { %v2793_v5 = vadd.f32 %v2792_v3, %v441_v61  ;;  %v2794_v6 = vpop.f32.mrb[25].mxu0  ;;  %v2834_v7 = vadd.f32 %v2833_v27, %v449_v62  ;;  %v2835_v11 = vpop.f32.mrb[25].mxu1  ;;  %v489_v27 = vrot.slane %v314_v39, %v6321_v37 }
 0x148   :  { %v2795_v9 = vadd.f32 %v2794_v6, %v445_v63  ;;  %v2796_v12 = vpop.f32.mrb[26].mxu0  ;;  %5599 = vst [vmem:[#allocation8 + $0x28] sm:$0xff] %v5119_v4  ;;  %v2836_v13 = vadd.f32 %v2835_v11, %v453_v2  ;;  %v2837_v14 = vpop.f32.mrb[26].mxu1 }
 0x149   :  { %v2797_v18 = vpop.f32.mrb[27].mxu0  ;;  %v2838_v21 = vpop.f32.mrb[27].mxu1  ;;  %v501_v12 = vrot.slane %v314_v39, %v6338_v53 }
 0x14a   :  { %v5120_v20 = vcombine.low %v2793_v5, %v2795_v9  ;;  %v5121_v22 = vcombine.low %v2834_v7, %v2836_v13  ;;  %v497_v7 = vrot.slane %v314_v39, %v6332_v44  ;;  %v493_v9 = vrot.slane %v314_v39, %v6335_v45 }
 0x14c   :  { %v5128_v23 = vrot.slane %v5120_v20, %v6328_v43  ;;  %v5135_v26 = vrot.slane %v5121_v22, %v6328_v43 }
 0x14e   :  { %v2874_v29 = vpop.f32.mrb[28].mxu0  ;;  %v5136_v30 = vcombine.low %v5128_v23, %v5135_v26  ;;  %v2915_v32 = vpop.f32.mrb[28].mxu1 }
 0x14f   :  { %v2875_v31 = vadd.f32 %v2874_v29, %v457_v15  ;;  %v2876_v34 = vpop.f32.mrb[29].mxu0  ;;  %v2916_v35 = vadd.f32 %v2915_v32, %v465_v24  ;;  %v2917_v0 = vpop.f32.mrb[29].mxu1 }
 0x150   :  { %v2877_v36 = vadd.f32 %v2876_v34, %v461_v25  ;;  %v2878_v38 = vpop.f32.mrb[30].mxu0  ;;  %5600 = vst [vmem:[#allocation8 + $0x30] sm:$0xff] %v5136_v30  ;;  %v2918_v40 = vadd.f32 %v2917_v0, %v469_v28  ;;  %v2919_v41 = vpop.f32.mrb[30].mxu1  ;;  %v315_v25 = vld [vmem:[#allocation7 + $0x28] sm:$0xff] }
 0x151   :  { %v2879_v42 = vpop.f32.mrb[31].mxu0  ;;  %v2920_v47 = vpop.f32.mrb[31].mxu1  ;;  %v505_v34 = vrot.slane %v315_v25, %v6294_v8  ;;  %v509_v0 = vrot.slane %v315_v25, %v6302_v17  ;;  %v517_v39 = vrot.slane %v315_v25, %v6305_v19 }
 0x152   :  { %v5137_v46 = vcombine.low %v2875_v31, %v2877_v36  ;;  %v5138_v48 = vcombine.low %v2916_v35, %v2918_v40  ;;  %v513_v36 = vrot.slane %v315_v25, %v6299_v16 }
 0x154   :  { %v5145_v50 = vrot.slane %v5137_v46, %v6328_v43  ;;  %v5152_v10 = vrot.slane %v5138_v48, %v6328_v43 }
 0x156   :  { %v2956_v54 = vpop.f32.mrb[32].mxu0  ;;  %v5153_v55 = vcombine.low %v5145_v50, %v5152_v10  ;;  %v2997_v57 = vpop.f32.mrb[32].mxu1 }
 0x157   :  { %v2957_v56 = vadd.f32 %v2956_v54, %v473_v49  ;;  %v2958_v58 = vpop.f32.mrb[33].mxu0  ;;  %v2998_v59 = vadd.f32 %v2997_v57, %v481_v51  ;;  %v2999_v60 = vpop.f32.mrb[33].mxu1  ;;  %v521_v57 = vrot.slane %v315_v25, %v6321_v37 }
 0x158   :  { %v2959_v61 = vadd.f32 %v2958_v58, %v477_v52  ;;  %v2960_v62 = vpop.f32.mrb[34].mxu0  ;;  %5601 = vst [vmem:[#allocation8 + $0x38] sm:$0xff] %v5153_v55  ;;  %v3000_v63 = vadd.f32 %v2999_v60, %v485_v33  ;;  %v3001_v1 = vpop.f32.mrb[34].mxu1 }
 0x159   :  { %v2961_v2 = vpop.f32.mrb[35].mxu0  ;;  %v3002_v4 = vpop.f32.mrb[35].mxu1  ;;  %v533_v62 = vrot.slane %v315_v25, %v6338_v53 }
 0x15a   :  { %v5154_v3 = vcombine.low %v2957_v56, %v2959_v61  ;;  %v5155_v5 = vcombine.low %v2998_v59, %v3000_v63  ;;  %v529_v59 = vrot.slane %v315_v25, %v6332_v44  ;;  %v525_v61 = vrot.slane %v315_v25, %v6335_v45 }
 0x15c   :  { %v5162_v6 = vrot.slane %v5154_v3, %v6328_v43  ;;  %v5169_v11 = vrot.slane %v5155_v5, %v6328_v43 }
 0x15e   :  { %v3038_v13 = vpop.f32.mrb[36].mxu0  ;;  %v5170_v14 = vcombine.low %v5162_v6, %v5169_v11  ;;  %v3079_v20 = vpop.f32.mrb[36].mxu1 }
 0x15f   :  { %v3039_v18 = vadd.f32 %v3038_v13, %v489_v27  ;;  %v3040_v21 = vpop.f32.mrb[37].mxu0  ;;  %v3080_v22 = vadd.f32 %v3079_v20, %v497_v7  ;;  %v3081_v23 = vpop.f32.mrb[37].mxu1 }
 0x160   :  { %v3041_v15 = vadd.f32 %v3040_v21, %v493_v9  ;;  %v3042_v24 = vpop.f32.mrb[38].mxu0  ;;  %5602 = vst [vmem:[#allocation8 + $0x40] sm:$0xff] %v5170_v14  ;;  %v3082_v26 = vadd.f32 %v3081_v23, %v501_v12  ;;  %v3083_v28 = vpop.f32.mrb[38].mxu1  ;;  %v316_v9 = vld [vmem:[#allocation7 + $0x30] sm:$0xff] }
 0x161   :  { %v3043_v29 = vpop.f32.mrb[39].mxu0  ;;  %v3084_v31 = vpop.f32.mrb[39].mxu1  ;;  %v537_v21 = vrot.slane %v316_v9, %v6294_v8  ;;  %v541_v23 = vrot.slane %v316_v9, %v6302_v17  ;;  %v549_v25 = vrot.slane %v316_v9, %v6305_v19 }
 0x162   :  { %v5171_v30 = vcombine.low %v3039_v18, %v3041_v15  ;;  %v5172_v32 = vcombine.low %v3080_v22, %v3082_v26  ;;  %v545_v15 = vrot.slane %v316_v9, %v6299_v16 }
 0x164   :  { %v5179_v35 = vrot.slane %v5171_v30, %v6328_v43  ;;  %v5186_v38 = vrot.slane %v5172_v32, %v6328_v43 }
 0x166   :  { %v3120_v40 = vpop.f32.mrb[40].mxu0  ;;  %v5187_v41 = vcombine.low %v5179_v35, %v5186_v38  ;;  %v3161_v46 = vpop.f32.mrb[40].mxu1 }
 0x167   :  { %v3121_v42 = vadd.f32 %v3120_v40, %v505_v34  ;;  %v3122_v47 = vpop.f32.mrb[41].mxu0  ;;  %v3162_v48 = vadd.f32 %v3161_v46, %v513_v36  ;;  %v3163_v50 = vpop.f32.mrb[41].mxu1  ;;  %v553_v46 = vrot.slane %v316_v9, %v6321_v37 }
 0x168   :  { %v3123_v49 = vadd.f32 %v3122_v47, %v509_v0  ;;  %v3124_v51 = vpop.f32.mrb[42].mxu0  ;;  %5603 = vst [vmem:[#allocation8 + $0x48] sm:$0xff] %v5187_v41  ;;  %v3164_v52 = vadd.f32 %v3163_v50, %v517_v39  ;;  %v3165_v10 = vpop.f32.mrb[42].mxu1 }
 0x169   :  { %v3125_v33 = vpop.f32.mrb[43].mxu0  ;;  %v3166_v55 = vpop.f32.mrb[43].mxu1  ;;  %v565_v51 = vrot.slane %v316_v9, %v6338_v53 }
 0x16a   :  { %v5188_v54 = vcombine.low %v3121_v42, %v3123_v49  ;;  %v5189_v56 = vcombine.low %v3162_v48, %v3164_v52  ;;  %v561_v48 = vrot.slane %v316_v9, %v6332_v44  ;;  %v557_v49 = vrot.slane %v316_v9, %v6335_v45 }
 0x16c   :  { %v5196_v58 = vrot.slane %v5188_v54, %v6328_v43  ;;  %v5203_v60 = vrot.slane %v5189_v56, %v6328_v43 }
 0x16e   :  { %v3202_v63 = vpop.f32.mrb[44].mxu0  ;;  %v5204_v1 = vcombine.low %v5196_v58, %v5203_v60  ;;  %v3243_v3 = vpop.f32.mrb[44].mxu1 }
 0x16f   :  { %v3203_v2 = vadd.f32 %v3202_v63, %v521_v57  ;;  %v3204_v4 = vpop.f32.mrb[45].mxu0  ;;  %v3244_v5 = vadd.f32 %v3243_v3, %v529_v59  ;;  %v3245_v6 = vpop.f32.mrb[45].mxu1 }
 0x170   :  { %v3205_v27 = vadd.f32 %v3204_v4, %v525_v61  ;;  %v3206_v7 = vpop.f32.mrb[46].mxu0  ;;  %5604 = vst [vmem:[#allocation8 + $0x50] sm:$0xff] %v5204_v1  ;;  %v3246_v11 = vadd.f32 %v3245_v6, %v533_v62  ;;  %v3247_v12 = vpop.f32.mrb[46].mxu1  ;;  %v317_v61 = vld [vmem:[#allocation7 + $0x38] sm:$0xff] }
 0x171   :  { %v3207_v13 = vpop.f32.mrb[47].mxu0  ;;  %v3248_v18 = vpop.f32.mrb[47].mxu1  ;;  %v569_v4 = vrot.slane %v317_v61, %v6294_v8  ;;  %v573_v6 = vrot.slane %v317_v61, %v6302_v17  ;;  %v581_v9 = vrot.slane %v317_v61, %v6305_v19 }
 0x172   :  { %v5205_v14 = vcombine.low %v3203_v2, %v3205_v27  ;;  %v5206_v20 = vcombine.low %v3244_v5, %v3246_v11  ;;  %v577_v27 = vrot.slane %v317_v61, %v6299_v16 }
 0x174   :  { %v5213_v22 = vrot.slane %v5205_v14, %v6328_v43  ;;  %v5220_v24 = vrot.slane %v5206_v20, %v6328_v43 }
 0x176   :  { %v3284_v26 = vpop.f32.mrb[48].mxu0  ;;  %v5221_v28 = vcombine.low %v5213_v22, %v5220_v24  ;;  %v3325_v30 = vpop.f32.mrb[48].mxu1 }
 0x177   :  { %v3285_v29 = vadd.f32 %v3284_v26, %v537_v21  ;;  %v3286_v31 = vpop.f32.mrb[49].mxu0  ;;  %v3326_v32 = vadd.f32 %v3325_v30, %v545_v15  ;;  %v3327_v35 = vpop.f32.mrb[49].mxu1  ;;  %v585_v30 = vrot.slane %v317_v61, %v6321_v37 }
 0x178   :  { %v3287_v34 = vadd.f32 %v3286_v31, %v541_v23  ;;  %v3288_v36 = vpop.f32.mrb[50].mxu0  ;;  %5605 = vst [vmem:[#allocation8 + $0x58] sm:$0xff] %v5221_v28  ;;  %v3328_v0 = vadd.f32 %v3327_v35, %v549_v25  ;;  %v3329_v38 = vpop.f32.mrb[50].mxu1 }
 0x179   :  { %v3289_v39 = vpop.f32.mrb[51].mxu0  ;;  %v3330_v41 = vpop.f32.mrb[51].mxu1  ;;  %v597_v36 = vrot.slane %v317_v61, %v6338_v53 }
 0x17a   :  { %v5222_v40 = vcombine.low %v3285_v29, %v3287_v34  ;;  %v5223_v42 = vcombine.low %v3326_v32, %v3328_v0  ;;  %v593_v32 = vrot.slane %v317_v61, %v6332_v44  ;;  %v589_v34 = vrot.slane %v317_v61, %v6335_v45 }
 0x17c   :  { %v5230_v47 = vrot.slane %v5222_v40, %v6328_v43  ;;  %v5237_v50 = vrot.slane %v5223_v42, %v6328_v43 }
 0x17e   :  { %v3366_v52 = vpop.f32.mrb[52].mxu0  ;;  %v5238_v10 = vcombine.low %v5230_v47, %v5237_v50  ;;  %v3407_v54 = vpop.f32.mrb[52].mxu1 }
 0x17f   :  { %v3367_v33 = vadd.f32 %v3366_v52, %v553_v46  ;;  %v3368_v55 = vpop.f32.mrb[53].mxu0  ;;  %v3408_v56 = vadd.f32 %v3407_v54, %v561_v48  ;;  %v3409_v58 = vpop.f32.mrb[53].mxu1 }
 0x180   :  { %v3369_v57 = vadd.f32 %v3368_v55, %v557_v49  ;;  %v3370_v59 = vpop.f32.mrb[54].mxu0  ;;  %5606 = vst [vmem:[#allocation8 + $0x60] sm:$0xff] %v5238_v10  ;;  %v3410_v60 = vadd.f32 %v3409_v58, %v565_v51  ;;  %v3411_v62 = vpop.f32.mrb[54].mxu1  ;;  %v318_v49 = vld [vmem:[#allocation7 + $0x40] sm:$0xff] }
 0x181   :  { %v3371_v63 = vpop.f32.mrb[55].mxu0  ;;  %v3412_v2 = vpop.f32.mrb[55].mxu1  ;;  %v601_v55 = vrot.slane %v318_v49, %v6294_v8  ;;  %v605_v58 = vrot.slane %v318_v49, %v6302_v17  ;;  %v613_v61 = vrot.slane %v318_v49, %v6305_v19 }
 0x182   :  { %v5239_v1 = vcombine.low %v3367_v33, %v3369_v57  ;;  %v5240_v3 = vcombine.low %v3408_v56, %v3410_v60  ;;  %v609_v57 = vrot.slane %v318_v49, %v6299_v16 }
 0x184   :  { %v5247_v5 = vrot.slane %v5239_v1, %v6328_v43  ;;  %v5254_v7 = vrot.slane %v5240_v3, %v6328_v43 }
 0x186   :  { %v3448_v11 = vpop.f32.mrb[56].mxu0  ;;  %v5255_v12 = vcombine.low %v5247_v5, %v5254_v7  ;;  %v3489_v14 = vpop.f32.mrb[56].mxu1 }
 0x187   :  { %v3449_v13 = vadd.f32 %v3448_v11, %v569_v4  ;;  %v3450_v18 = vpop.f32.mrb[57].mxu0  ;;  %v3490_v20 = vadd.f32 %v3489_v14, %v577_v27  ;;  %v3491_v22 = vpop.f32.mrb[57].mxu1  ;;  %v617_v14 = vrot.slane %v318_v49, %v6321_v37 }
 0x188   :  { %v3451_v21 = vadd.f32 %v3450_v18, %v573_v6  ;;  %v3452_v15 = vpop.f32.mrb[58].mxu0  ;;  %5607 = vst [vmem:[#allocation8 + $0x68] sm:$0xff] %v5255_v12  ;;  %v3492_v23 = vadd.f32 %v3491_v22, %v581_v9  ;;  %v3493_v24 = vpop.f32.mrb[58].mxu1 }
 0x189   :  { %v3453_v25 = vpop.f32.mrb[59].mxu0  ;;  %v3494_v28 = vpop.f32.mrb[59].mxu1  ;;  %v629_v15 = vrot.slane %v318_v49, %v6338_v53 }
 0x18a   :  { %v5256_v26 = vcombine.low %v3449_v13, %v3451_v21  ;;  %v5257_v29 = vcombine.low %v3490_v20, %v3492_v23  ;;  %v625_v20 = vrot.slane %v318_v49, %v6332_v44  ;;  %v621_v21 = vrot.slane %v318_v49, %v6335_v45 }
 0x18c   :  { %v5264_v31 = vrot.slane %v5256_v26, %v6328_v43  ;;  %v5271_v35 = vrot.slane %v5257_v29, %v6328_v43 }
 0x18e   :  { %v3530_v0 = vpop.f32.mrb[60].mxu0  ;;  %v5272_v38 = vcombine.low %v5264_v31, %v5271_v35  ;;  %v3571_v40 = vpop.f32.mrb[60].mxu1 }
 0x18f   :  { %v3531_v39 = vadd.f32 %v3530_v0, %v585_v30  ;;  %v3532_v41 = vpop.f32.mrb[61].mxu0  ;;  %v3572_v42 = vadd.f32 %v3571_v40, %v593_v32  ;;  %v3573_v47 = vpop.f32.mrb[61].mxu1 }
 0x190   :  { %v3533_v46 = vadd.f32 %v3532_v41, %v589_v34  ;;  %v3534_v48 = vpop.f32.mrb[62].mxu0  ;;  %5608 = vst [vmem:[#allocation8 + $0x70] sm:$0xff] %v5272_v38  ;;  %v3574_v50 = vadd.f32 %v3573_v47, %v597_v36  ;;  %v3575_v51 = vpop.f32.mrb[62].mxu1  ;;  %v319_v34 = vld [vmem:[#allocation7 + $0x48] sm:$0xff] }
 0x191   :  { %v3535_v52 = vpop.f32.mrb[63].mxu0  ;;  %v3576_v33 = vpop.f32.mrb[63].mxu1  ;;  %v633_v41 = vrot.slane %v319_v34, %v6294_v8  ;;  %v637_v47 = vrot.slane %v319_v34, %v6302_v17  ;;  %v645_v49 = vrot.slane %v319_v34, %v6305_v19 }
 0x192   :  { %v5273_v10 = vcombine.low %v3531_v39, %v3533_v46  ;;  %v5274_v54 = vcombine.low %v3572_v42, %v3574_v50  ;;  %v641_v46 = vrot.slane %v319_v34, %v6299_v16 }
 0x194   :  { %v5281_v56 = vrot.slane %v5273_v10, %v6328_v43  ;;  %v5288_v59 = vrot.slane %v5274_v54, %v6328_v43 }
 0x196   :  { %v3612_v60 = vpop.f32.mrb[64].mxu0  ;;  %v5289_v62 = vcombine.low %v5281_v56, %v5288_v59  ;;  %v3653_v1 = vpop.f32.mrb[64].mxu1 }
 0x197   :  { %v3613_v63 = vadd.f32 %v3612_v60, %v601_v55  ;;  %v3614_v2 = vpop.f32.mrb[65].mxu0  ;;  %v3654_v3 = vadd.f32 %v3653_v1, %v609_v57  ;;  %v3655_v5 = vpop.f32.mrb[65].mxu1  ;;  %v649_v1 = vrot.slane %v319_v34, %v6321_v37 }
 0x198   :  { %v3615_v4 = vadd.f32 %v3614_v2, %v605_v58  ;;  %v3616_v27 = vpop.f32.mrb[66].mxu0  ;;  %5609 = vst [vmem:[#allocation8 + $0x78] sm:$0xff] %v5289_v62  ;;  %v3656_v6 = vadd.f32 %v3655_v5, %v613_v61  ;;  %v3657_v7 = vpop.f32.mrb[66].mxu1 }
 0x199   :  { %v3617_v9 = vpop.f32.mrb[67].mxu0  ;;  %v3658_v12 = vpop.f32.mrb[67].mxu1  ;;  %v661_v27 = vrot.slane %v319_v34, %v6338_v53 }
 0x19a   :  { %v5290_v11 = vcombine.low %v3613_v63, %v3615_v4  ;;  %v5291_v13 = vcombine.low %v3654_v3, %v3656_v6  ;;  %v657_v3 = vrot.slane %v319_v34, %v6332_v44  ;;  %v653_v4 = vrot.slane %v319_v34, %v6335_v45 }
 0x19c   :  { %v5298_v18 = vrot.slane %v5290_v11, %v6328_v43  ;;  %v5305_v22 = vrot.slane %v5291_v13, %v6328_v43 }
 0x19e   :  { %v3694_v23 = vpop.f32.mrb[68].mxu0  ;;  %v5306_v24 = vcombine.low %v5298_v18, %v5305_v22  ;;  %v3735_v26 = vpop.f32.mrb[68].mxu1 }
 0x19f   :  { %v3695_v25 = vadd.f32 %v3694_v23, %v617_v14  ;;  %v3696_v28 = vpop.f32.mrb[69].mxu0  ;;  %v3736_v29 = vadd.f32 %v3735_v26, %v625_v20  ;;  %v3737_v31 = vpop.f32.mrb[69].mxu1 }
 0x1a0   :  { %v3697_v30 = vadd.f32 %v3696_v28, %v621_v21  ;;  %v3698_v32 = vpop.f32.mrb[70].mxu0  ;;  %5610 = vst [vmem:[#allocation8 + $0x80] sm:$0xff] %v5306_v24  ;;  %v3738_v35 = vadd.f32 %v3737_v31, %v629_v15  ;;  %v3739_v36 = vpop.f32.mrb[70].mxu1  ;;  %v320_v21 = vld [vmem:[#allocation7 + $0x50] sm:$0xff] }
 0x1a1   :  { %v3699_v0 = vpop.f32.mrb[71].mxu0  ;;  %v3740_v39 = vpop.f32.mrb[71].mxu1  ;;  %v665_v28 = vrot.slane %v320_v21, %v6294_v8  ;;  %v669_v31 = vrot.slane %v320_v21, %v6302_v17  ;;  %v677_v34 = vrot.slane %v320_v21, %v6305_v19 }
 0x1a2   :  { %v5307_v38 = vcombine.low %v3695_v25, %v3697_v30  ;;  %v5308_v40 = vcombine.low %v3736_v29, %v3738_v35  ;;  %v673_v30 = vrot.slane %v320_v21, %v6299_v16 }
 0x1a4   :  { %v5315_v42 = vrot.slane %v5307_v38, %v6328_v43  ;;  %v5322_v48 = vrot.slane %v5308_v40, %v6328_v43 }
 0x1a6   :  { %v3776_v50 = vpop.f32.mrb[72].mxu0  ;;  %v5323_v51 = vcombine.low %v5315_v42, %v5322_v48  ;;  %v3817_v10 = vpop.f32.mrb[72].mxu1 }
 0x1a7   :  { %v3777_v52 = vadd.f32 %v3776_v50, %v633_v41  ;;  %v3778_v33 = vpop.f32.mrb[73].mxu0  ;;  %v3818_v54 = vadd.f32 %v3817_v10, %v641_v46  ;;  %v3819_v56 = vpop.f32.mrb[73].mxu1  ;;  %v681_v10 = vrot.slane %v320_v21, %v6321_v37 }
 0x1a8   :  { %v3779_v55 = vadd.f32 %v3778_v33, %v637_v47  ;;  %v3780_v57 = vpop.f32.mrb[74].mxu0  ;;  %5611 = vst [vmem:[#allocation8 + $0x88] sm:$0xff] %v5323_v51  ;;  %v3820_v58 = vadd.f32 %v3819_v56, %v645_v49  ;;  %v3821_v59 = vpop.f32.mrb[74].mxu1 }
 0x1a9   :  { %v3781_v61 = vpop.f32.mrb[75].mxu0  ;;  %v3822_v62 = vpop.f32.mrb[75].mxu1  ;;  %v693_v57 = vrot.slane %v320_v21, %v6338_v53 }
 0x1aa   :  { %v5324_v60 = vcombine.low %v3777_v52, %v3779_v55  ;;  %v5325_v63 = vcombine.low %v3818_v54, %v3820_v58  ;;  %v689_v54 = vrot.slane %v320_v21, %v6332_v44  ;;  %v685_v55 = vrot.slane %v320_v21, %v6335_v45 }
 0x1ac   :  { %v5332_v2 = vrot.slane %v5324_v60, %v6328_v43  ;;  %v5339_v5 = vrot.slane %v5325_v63, %v6328_v43 }
 0x1ae   :  { %v3858_v6 = vpop.f32.mrb[76].mxu0  ;;  %v5340_v7 = vcombine.low %v5332_v2, %v5339_v5  ;;  %v3899_v11 = vpop.f32.mrb[76].mxu1 }
 0x1af   :  { %v3859_v9 = vadd.f32 %v3858_v6, %v649_v1  ;;  %v3860_v12 = vpop.f32.mrb[77].mxu0  ;;  %v3900_v13 = vadd.f32 %v3899_v11, %v657_v3  ;;  %v3901_v18 = vpop.f32.mrb[77].mxu1 }
 0x1b0   :  { %v3861_v14 = vadd.f32 %v3860_v12, %v653_v4  ;;  %v3862_v20 = vpop.f32.mrb[78].mxu0  ;;  %5612 = vst [vmem:[#allocation8 + $0x90] sm:$0xff] %v5340_v7  ;;  %v3902_v22 = vadd.f32 %v3901_v18, %v661_v27  ;;  %v3903_v15 = vpop.f32.mrb[78].mxu1  ;;  %v321_v4 = vld [vmem:[#allocation7 + $0x58] sm:$0xff] }
 0x1b1   :  { %v3863_v23 = vpop.f32.mrb[79].mxu0  ;;  %v3904_v25 = vpop.f32.mrb[79].mxu1  ;;  %v697_v12 = vrot.slane %v321_v4, %v6294_v8  ;;  %v701_v18 = vrot.slane %v321_v4, %v6302_v17  ;;  %v709_v21 = vrot.slane %v321_v4, %v6305_v19 }
 0x1b2   :  { %v5341_v24 = vcombine.low %v3859_v9, %v3861_v14  ;;  %v5342_v26 = vcombine.low %v3900_v13, %v3902_v22  ;;  %v705_v14 = vrot.slane %v321_v4, %v6299_v16 }
 0x1b4   :  { %v5349_v29 = vrot.slane %v5341_v24, %v6328_v43  ;;  %v5356_v32 = vrot.slane %v5342_v26, %v6328_v43 }
 0x1b6   :  { %v3940_v35 = vpop.f32.mrb[80].mxu0  ;;  %v5357_v36 = vcombine.low %v5349_v29, %v5356_v32  ;;  %v3981_v38 = vpop.f32.mrb[80].mxu1 }
 0x1b7   :  { %v3941_v0 = vadd.f32 %v3940_v35, %v665_v28  ;;  %v3942_v39 = vpop.f32.mrb[81].mxu0  ;;  %v3982_v40 = vadd.f32 %v3981_v38, %v673_v30  ;;  %v3983_v42 = vpop.f32.mrb[81].mxu1  ;;  %v713_v38 = vrot.slane %v321_v4, %v6321_v37 }
 0x1b8   :  { %v3943_v41 = vadd.f32 %v3942_v39, %v669_v31  ;;  %v3944_v46 = vpop.f32.mrb[82].mxu0  ;;  %5613 = vst [vmem:[#allocation8 + $0x98] sm:$0xff] %v5357_v36  ;;  %v3984_v47 = vadd.f32 %v3983_v42, %v677_v34  ;;  %v3985_v48 = vpop.f32.mrb[82].mxu1 }
 0x1b9   :  { %v3945_v49 = vpop.f32.mrb[83].mxu0  ;;  %v3986_v51 = vpop.f32.mrb[83].mxu1  ;;  %v725_v46 = vrot.slane %v321_v4, %v6338_v53 }
 0x1ba   :  { %v5358_v50 = vcombine.low %v3941_v0, %v3943_v41  ;;  %v5359_v52 = vcombine.low %v3982_v40, %v3984_v47  ;;  %v721_v40 = vrot.slane %v321_v4, %v6332_v44  ;;  %v717_v41 = vrot.slane %v321_v4, %v6335_v45 }
 0x1bc   :  { %v5366_v33 = vrot.slane %v5358_v50, %v6328_v43  ;;  %v5373_v56 = vrot.slane %v5359_v52, %v6328_v43 }
 0x1be   :  { %v4022_v58 = vpop.f32.mrb[84].mxu0  ;;  %v5374_v59 = vcombine.low %v5366_v33, %v5373_v56  ;;  %v4063_v60 = vpop.f32.mrb[84].mxu1 }
 0x1bf   :  { %v4023_v61 = vadd.f32 %v4022_v58, %v681_v10  ;;  %v4024_v62 = vpop.f32.mrb[85].mxu0  ;;  %v4064_v63 = vadd.f32 %v4063_v60, %v689_v54  ;;  %v4065_v2 = vpop.f32.mrb[85].mxu1 }
 0x1c0   :  { %v4025_v1 = vadd.f32 %v4024_v62, %v685_v55  ;;  %v4026_v3 = vpop.f32.mrb[86].mxu0  ;;  %5614 = vst [vmem:[#allocation8 + $0xa0] sm:$0xff] %v5374_v59  ;;  %v4066_v5 = vadd.f32 %v4065_v2, %v693_v57  ;;  %v4067_v27 = vpop.f32.mrb[86].mxu1  ;;  %v322_v55 = vld [vmem:[#allocation7 + $0x60] sm:$0xff] }
 0x1c1   :  { %v4027_v6 = vpop.f32.mrb[87].mxu0  ;;  %v4068_v9 = vpop.f32.mrb[87].mxu1  ;;  %v729_v62 = vrot.slane %v322_v55, %v6294_v8  ;;  %v733_v2 = vrot.slane %v322_v55, %v6302_v17  ;;  %v741_v4 = vrot.slane %v322_v55, %v6305_v19 }
 0x1c2   :  { %v5375_v7 = vcombine.low %v4023_v61, %v4025_v1  ;;  %v5376_v11 = vcombine.low %v4064_v63, %v4066_v5  ;;  %v737_v1 = vrot.slane %v322_v55, %v6299_v16 }
 0x1c4   :  { %v5383_v13 = vrot.slane %v5375_v7, %v6328_v43  ;;  %v5390_v20 = vrot.slane %v5376_v11, %v6328_v43 }
 0x1c6   :  { %v4104_v22 = vpop.f32.mrb[88].mxu0  ;;  %v5391_v15 = vcombine.low %v5383_v13, %v5390_v20  ;;  %v4145_v24 = vpop.f32.mrb[88].mxu1 }
 0x1c7   :  { %v4105_v23 = vadd.f32 %v4104_v22, %v697_v12  ;;  %v4106_v25 = vpop.f32.mrb[89].mxu0  ;;  %v4146_v26 = vadd.f32 %v4145_v24, %v705_v14  ;;  %v4147_v29 = vpop.f32.mrb[89].mxu1  ;;  %v745_v24 = vrot.slane %v322_v55, %v6321_v37 }
 0x1c8   :  { %v4107_v28 = vadd.f32 %v4106_v25, %v701_v18  ;;  %v4108_v30 = vpop.f32.mrb[90].mxu0  ;;  %5615 = vst [vmem:[#allocation8 + $0xa8] sm:$0xff] %v5391_v15  ;;  %v4148_v31 = vadd.f32 %v4147_v29, %v709_v21  ;;  %v4149_v32 = vpop.f32.mrb[90].mxu1 }
 0x1c9   :  { %v4109_v34 = vpop.f32.mrb[91].mxu0  ;;  %v4150_v36 = vpop.f32.mrb[91].mxu1  ;;  %v757_v30 = vrot.slane %v322_v55, %v6338_v53 }
 0x1ca   :  { %v5392_v35 = vcombine.low %v4105_v23, %v4107_v28  ;;  %v5393_v0 = vcombine.low %v4146_v26, %v4148_v31  ;;  %v753_v26 = vrot.slane %v322_v55, %v6332_v44  ;;  %v749_v28 = vrot.slane %v322_v55, %v6335_v45 }
 0x1cc   :  { %v5400_v39 = vrot.slane %v5392_v35, %v6328_v43  ;;  %v5407_v42 = vrot.slane %v5393_v0, %v6328_v43 }
 0x1ce   :  { %v4186_v47 = vpop.f32.mrb[92].mxu0  ;;  %v5408_v48 = vcombine.low %v5400_v39, %v5407_v42  ;;  %v4227_v50 = vpop.f32.mrb[92].mxu1 }
 0x1cf   :  { %v4187_v49 = vadd.f32 %v4186_v47, %v713_v38  ;;  %v4188_v51 = vpop.f32.mrb[93].mxu0  ;;  %v4228_v52 = vadd.f32 %v4227_v50, %v721_v40  ;;  %v4229_v33 = vpop.f32.mrb[93].mxu1 }
 0x1d0   :  { %v4189_v10 = vadd.f32 %v4188_v51, %v717_v41  ;;  %v4190_v54 = vpop.f32.mrb[94].mxu0  ;;  %5616 = vst [vmem:[#allocation8 + $0xb0] sm:$0xff] %v5408_v48  ;;  %v4230_v56 = vadd.f32 %v4229_v33, %v725_v46  ;;  %v4231_v57 = vpop.f32.mrb[94].mxu1  ;;  %v323_v41 = vld [vmem:[#allocation7 + $0x68] sm:$0xff] }
 0x1d1   :  { %v4191_v58 = vpop.f32.mrb[95].mxu0  ;;  %v4232_v61 = vpop.f32.mrb[95].mxu1  ;;  %v761_v51 = vrot.slane %v323_v41, %v6294_v8  ;;  %v765_v33 = vrot.slane %v323_v41, %v6302_v17  ;;  %v773_v55 = vrot.slane %v323_v41, %v6305_v19 }
 0x1d2   :  { %v5409_v59 = vcombine.low %v4187_v49, %v4189_v10  ;;  %v5410_v60 = vcombine.low %v4228_v52, %v4230_v56  ;;  %v769_v10 = vrot.slane %v323_v41, %v6299_v16 }
 0x1d4   :  { %v5417_v63 = vrot.slane %v5409_v59, %v6328_v43  ;;  %v5424_v3 = vrot.slane %v5410_v60, %v6328_v43 }
 0x1d6   :  { %v4268_v5 = vpop.f32.mrb[96].mxu0  ;;  %v5425_v27 = vcombine.low %v5417_v63, %v5424_v3  ;;  %v4309_v7 = vpop.f32.mrb[96].mxu1 }
 0x1d7   :  { %v4269_v6 = vadd.f32 %v4268_v5, %v729_v62  ;;  %v4270_v9 = vpop.f32.mrb[97].mxu0  ;;  %v4310_v11 = vadd.f32 %v4309_v7, %v737_v1  ;;  %v4311_v13 = vpop.f32.mrb[97].mxu1  ;;  %v777_v7 = vrot.slane %v323_v41, %v6321_v37 }
 0x1d8   :  { %v4271_v12 = vadd.f32 %v4270_v9, %v733_v2  ;;  %v4272_v14 = vpop.f32.mrb[98].mxu0  ;;  %5617 = vst [vmem:[#allocation8 + $0xb8] sm:$0xff] %v5425_v27  ;;  %v4312_v18 = vadd.f32 %v4311_v13, %v741_v4  ;;  %v4313_v20 = vpop.f32.mrb[98].mxu1 }
 0x1d9   :  { %v4273_v21 = vpop.f32.mrb[99].mxu0  ;;  %v4314_v15 = vpop.f32.mrb[99].mxu1  ;;  %v789_v14 = vrot.slane %v323_v41, %v6338_v53 }
 0x1da   :  { %v5426_v22 = vcombine.low %v4269_v6, %v4271_v12  ;;  %v5427_v23 = vcombine.low %v4310_v11, %v4312_v18  ;;  %v785_v11 = vrot.slane %v323_v41, %v6332_v44  ;;  %v781_v12 = vrot.slane %v323_v41, %v6335_v45 }
 0x1dc   :  { %v5434_v25 = vrot.slane %v5426_v22, %v6328_v43  ;;  %v5441_v29 = vrot.slane %v5427_v23, %v6328_v43 }
 0x1de   :  { %v4350_v31 = vpop.f32.mrb[100].mxu0  ;;  %v5442_v32 = vcombine.low %v5434_v25, %v5441_v29  ;;  %v4391_v35 = vpop.f32.mrb[100].mxu1 }
 0x1df   :  { %v4351_v34 = vadd.f32 %v4350_v31, %v745_v24  ;;  %v4352_v36 = vpop.f32.mrb[101].mxu0  ;;  %v4392_v0 = vadd.f32 %v4391_v35, %v753_v26  ;;  %v4393_v39 = vpop.f32.mrb[101].mxu1 }
 0x1e0   :  { %v4353_v38 = vadd.f32 %v4352_v36, %v749_v28  ;;  %v4354_v40 = vpop.f32.mrb[102].mxu0  ;;  %5618 = vst [vmem:[#allocation8 + $0xc0] sm:$0xff] %v5442_v32  ;;  %v4394_v42 = vadd.f32 %v4393_v39, %v757_v30  ;;  %v4395_v46 = vpop.f32.mrb[102].mxu1  ;;  %v324_v28 = vld [vmem:[#allocation7 + $0x70] sm:$0xff] }
 0x1e1   :  { %v4355_v47 = vpop.f32.mrb[103].mxu0  ;;  %v4396_v49 = vpop.f32.mrb[103].mxu1  ;;  %v793_v36 = vrot.slane %v324_v28, %v6294_v8  ;;  %v797_v39 = vrot.slane %v324_v28, %v6302_v17  ;;  %v805_v41 = vrot.slane %v324_v28, %v6305_v19 }
 0x1e2   :  { %v5443_v48 = vcombine.low %v4351_v34, %v4353_v38  ;;  %v5444_v50 = vcombine.low %v4392_v0, %v4394_v42  ;;  %v801_v38 = vrot.slane %v324_v28, %v6299_v16 }
 0x1e4   :  { %v5451_v52 = vrot.slane %v5443_v48, %v6328_v43  ;;  %v5458_v54 = vrot.slane %v5444_v50, %v6328_v43 }
 0x1e6   :  { %v4432_v56 = vpop.f32.mrb[104].mxu0  ;;  %v5459_v57 = vcombine.low %v5451_v52, %v5458_v54  ;;  %v4473_v59 = vpop.f32.mrb[104].mxu1 }
 0x1e7   :  { %v4433_v58 = vadd.f32 %v4432_v56, %v761_v51  ;;  %v4434_v61 = vpop.f32.mrb[105].mxu0  ;;  %v4474_v60 = vadd.f32 %v4473_v59, %v769_v10  ;;  %v4475_v63 = vpop.f32.mrb[105].mxu1  ;;  %v809_v59 = vrot.slane %v324_v28, %v6321_v37 }
 0x1e8   :  { %v4435_v62 = vadd.f32 %v4434_v61, %v765_v33  ;;  %v4436_v1 = vpop.f32.mrb[106].mxu0  ;;  %5619 = vst [vmem:[#allocation8 + $0xc8] sm:$0xff] %v5459_v57  ;;  %v4476_v2 = vadd.f32 %v4475_v63, %v773_v55  ;;  %v4477_v3 = vpop.f32.mrb[106].mxu1 }
 0x1e9   :  { %v4437_v4 = vpop.f32.mrb[107].mxu0  ;;  %v4478_v27 = vpop.f32.mrb[107].mxu1  ;;  %v821_v1 = vrot.slane %v324_v28, %v6338_v53 }
 0x1ea   :  { %v5460_v5 = vcombine.low %v4433_v58, %v4435_v62  ;;  %v5461_v6 = vcombine.low %v4474_v60, %v4476_v2  ;;  %v817_v60 = vrot.slane %v324_v28, %v6332_v44  ;;  %v813_v62 = vrot.slane %v324_v28, %v6335_v45 }
 0x1ec   :  { %v5468_v9 = vrot.slane %v5460_v5, %v6328_v43  ;;  %v5475_v13 = vrot.slane %v5461_v6, %v6328_v43 }
 0x1ee   :  { %v4514_v18 = vpop.f32.mrb[108].mxu0  ;;  %v5476_v20 = vcombine.low %v5468_v9, %v5475_v13  ;;  %v4555_v22 = vpop.f32.mrb[108].mxu1 }
 0x1ef   :  { %v4515_v21 = vadd.f32 %v4514_v18, %v777_v7  ;;  %v4516_v15 = vpop.f32.mrb[109].mxu0  ;;  %v4556_v23 = vadd.f32 %v4555_v22, %v785_v11  ;;  %v4557_v25 = vpop.f32.mrb[109].mxu1 }
 0x1f0   :  { %v4517_v24 = vadd.f32 %v4516_v15, %v781_v12  ;;  %v4518_v26 = vpop.f32.mrb[110].mxu0  ;;  %5620 = vst [vmem:[#allocation8 + $0xd0] sm:$0xff] %v5476_v20  ;;  %v4558_v29 = vadd.f32 %v4557_v25, %v789_v14  ;;  %v4559_v30 = vpop.f32.mrb[110].mxu1  ;;  %v325_v12 = vld [vmem:[#allocation7 + $0x78] sm:$0xff] }
 0x1f1   :  { %v4519_v31 = vpop.f32.mrb[111].mxu0  ;;  %v4560_v34 = vpop.f32.mrb[111].mxu1  ;;  %v825_v15 = vrot.slane %v325_v12, %v6294_v8  ;;  %v829_v25 = vrot.slane %v325_v12, %v6302_v17  ;;  %v837_v28 = vrot.slane %v325_v12, %v6305_v19 }
 0x1f2   :  { %v5477_v32 = vcombine.low %v4515_v21, %v4517_v24  ;;  %v5478_v35 = vcombine.low %v4556_v23, %v4558_v29  ;;  %v833_v24 = vrot.slane %v325_v12, %v6299_v16 }
 0x1f4   :  { %v5485_v0 = vrot.slane %v5477_v32, %v6328_v43  ;;  %v5492_v40 = vrot.slane %v5478_v35, %v6328_v43 }
 0x1f6   :  { %v4596_v42 = vpop.f32.mrb[112].mxu0  ;;  %v5493_v46 = vcombine.low %v5485_v0, %v5492_v40  ;;  %v4637_v48 = vpop.f32.mrb[112].mxu1 }
 0x1f7   :  { %v4597_v47 = vadd.f32 %v4596_v42, %v793_v36  ;;  %v4598_v49 = vpop.f32.mrb[113].mxu0  ;;  %v4638_v50 = vadd.f32 %v4637_v48, %v801_v38  ;;  %v4639_v52 = vpop.f32.mrb[113].mxu1  ;;  %v841_v42 = vrot.slane %v325_v12, %v6321_v37 }
 0x1f8   :  { %v4599_v51 = vadd.f32 %v4598_v49, %v797_v39  ;;  %v4600_v10 = vpop.f32.mrb[114].mxu0  ;;  %5621 = vst [vmem:[#allocation8 + $0xd8] sm:$0xff] %v5493_v46  ;;  %v4640_v33 = vadd.f32 %v4639_v52, %v805_v41  ;;  %v4641_v54 = vpop.f32.mrb[114].mxu1  ;;  %v849_v46 = vrot.slane %v325_v12, %v6332_v44  ;;  %v853_v49 = vrot.slane %v325_v12, %v6338_v53 }
 0x1f9   :  { %v4601_v55 = vpop.f32.mrb[115].mxu0  ;;  %v4642_v57 = vpop.f32.mrb[115].mxu1 }
 0x1fa   :  { %v5494_v56 = vcombine.low %v4597_v47, %v4599_v51  ;;  %v5495_v58 = vcombine.low %v4638_v50, %v4640_v33  ;;  %v845_v47 = vrot.slane %v325_v12, %v6335_v45 }
 0x1fc   :  { %v5502_v61 = vrot.slane %v5494_v56, %v6328_v43  ;;  %v5509_v63 = vrot.slane %v5495_v58, %v6328_v43 }
 0x1fe   :  { %v4678_v2 = vpop.f32.mrb[116].mxu0  ;;  %v5510_v3 = vcombine.low %v5502_v61, %v5509_v63  ;;  %v4719_v5 = vpop.f32.mrb[116].mxu1 }
 0x1ff   :  { %v4679_v4 = vadd.f32 %v4678_v2, %v809_v59  ;;  %v4680_v27 = vpop.f32.mrb[117].mxu0  ;;  %v4720_v6 = vadd.f32 %v4719_v5, %v817_v60  ;;  %v4721_v9 = vpop.f32.mrb[117].mxu1 }
 0x200   :  { %v4681_v7 = vadd.f32 %v4680_v27, %v813_v62  ;;  %v4682_v11 = vpop.f32.mrb[118].mxu0  ;;  %5622 = vst [vmem:[#allocation8 + $0xe0] sm:$0xff] %v5510_v3  ;;  %v4722_v13 = vadd.f32 %v4721_v9, %v821_v1  ;;  %v4723_v14 = vpop.f32.mrb[118].mxu1 }
 0x201   :  { %v4683_v18 = vpop.f32.mrb[119].mxu0  ;;  %v4724_v21 = vpop.f32.mrb[119].mxu1 }
 0x202   :  { %v5511_v20 = vcombine.low %v4679_v4, %v4681_v7  ;;  %v5512_v22 = vcombine.low %v4720_v6, %v4722_v13 }
 0x204   :  { %v5519_v23 = vrot.slane %v5511_v20, %v6328_v43  ;;  %v5526_v26 = vrot.slane %v5512_v22, %v6328_v43 }
 0x206   :  { %v4760_v29 = vpop.f32.mrb[120].mxu0  ;;  %v5527_v30 = vcombine.low %v5519_v23, %v5526_v26  ;;  %v4801_v32 = vpop.f32.mrb[120].mxu1 }
 0x207   :  { %v4761_v31 = vadd.f32 %v4760_v29, %v825_v15  ;;  %v4762_v34 = vpop.f32.mrb[121].mxu0  ;;  %v4802_v35 = vadd.f32 %v4801_v32, %v833_v24  ;;  %v4803_v0 = vpop.f32.mrb[121].mxu1 }
 0x208   :  { %v4763_v36 = vadd.f32 %v4762_v34, %v829_v25  ;;  %v4764_v38 = vpop.f32.mrb[122].mxu0  ;;  %5623 = vst [vmem:[#allocation8 + $0xe8] sm:$0xff] %v5527_v30  ;;  %v4804_v8 = vadd.f32 %v4803_v0, %v837_v28  ;;  %v4805_v39 = vpop.f32.mrb[122].mxu1 }
 0x209   :  { %v4765_v40 = vpop.f32.mrb[123].mxu0  ;;  %v4806_v41 = vpop.f32.mrb[123].mxu1 }
 0x20a   :  { %v5528_v16 = vcombine.low %v4761_v31, %v4763_v36  ;;  %v5529_v17 = vcombine.low %v4802_v35, %v4804_v8 }
 0x20c   :  { %v5536_v19 = vrot.slane %v5528_v16, %v6328_v43  ;;  %v5543_v48 = vrot.slane %v5529_v17, %v6328_v43 }
 0x20e   :  { %v4842_v50 = vpop.f32.mrb[124].mxu0  ;;  %v5544_v51 = vcombine.low %v5536_v19, %v5543_v48  ;;  %v4883_v10 = vpop.f32.mrb[124].mxu1 }
 0x20f   :  { %v4843_v52 = vadd.f32 %v4842_v50, %v841_v42  ;;  %v4844_v33 = vpop.f32.mrb[125].mxu0  ;;  %v4884_v54 = vadd.f32 %v4883_v10, %v849_v46  ;;  %v4885_v56 = vpop.f32.mrb[125].mxu1 }
 0x210   :  { %v4845_v55 = vadd.f32 %v4844_v33, %v845_v47  ;;  %v4846_v57 = vpop.f32.mrb[126].mxu0  ;;  %5624 = vst [vmem:[#allocation8 + $0xf0] sm:$0xff] %v5544_v51  ;;  %v4886_v37 = vadd.f32 %v4885_v56, %v853_v49  ;;  %v4887_v58 = vpop.f32.mrb[126].mxu1 }
 0x211   :  { %v4847_v59 = vpop.f32.mrb[127].mxu0  ;;  %v4888_v61 = vpop.f32.mrb[127].mxu1 }
 0x212   :  { %v5545_v44 = vcombine.low %v4843_v52, %v4845_v55  ;;  %v5546_v45 = vcombine.low %v4884_v54, %v4886_v37 }
 0x214   :  { %v5553_v60 = vrot.slane %v5545_v44, %v6328_v43  ;;  %v5560_v53 = vrot.slane %v5546_v45, %v6328_v43 }
 0x216   :  { %v5561_v62 = vcombine.low %v5553_v60, %v5560_v53 }
 0x218   :  { %5625 = vst [vmem:[#allocation8 + $0xf8] sm:$0xff] %v5561_v62 }
 0x219   :  { %6048 = shalt.err (!%p6045_p0)
}
 0x21a   :  { %s6049_s26 = scalar_lea.hbm %s6611_s3, 4096 }
 0x21b   :  { %p6050_p1 = scmp.ne.s32.totalorder %s6611_s3, %s6049_s26  ;;  %p6053_p2 = scmp.lt.u32.totalorder %s6049_s26, %s6611_s3 }
 0x21d   :  { %p6055_p3 = pnand %p6053_p2, %p6050_p1 }
 0x21f   :  { %6058 = shalt.err (!%p6055_p3)
}
 0x220   :  { %5635 = dma.vmem_to_hbm [thread:$0]  %s5633_s22, 4096, %s6611_s3, [#allocation4]  }
 0x221   :  { %6063 = dma.done.wait [#allocation4], 4096  }
 0x222   :  { %6064 = vsyncadd [#allocation4], 4294963200 }
 0x223   :  { %5639 = vsyncpa [#allocation3], 1 }
 0x224   :  { %5640 = vsyncpa [#allocation6], 1 }
 0x225   :  { %5641 = vsyncpa [#allocation4], 1 }

</bundles_post_ra>
